<compile_context>
chip_gen: v6e
topology: v6e:2x2x1
jax: 0.10.0
libtpu: 0.0.40
codegen_flags: <defaults>
</compile_context>

<pallas_src>
import jax
import jax.numpy as jnp
from jax import lax
from jax.experimental import pallas as pl
from jax.experimental.pallas import tpu as pltpu


def lstm_fwd_kernel(x_ref, wih_ref, whh_ref, b_ref, wlin_ref, blin_ref,
                    out_ref, xw_ref):
    # x_ref:    (L, 1)       f32        VMEM  — scalar inputs (input_size == 1)
    # wih_ref:  (1, 4*Hp)    f32        VMEM  — fused W_ih (gate blocks i|f|o|g)
    # whh_ref:  (Hp, 4*Hp)   bf16/f32   VMEM  — fused W_hh^T per gate, lane-dense
    # b_ref:    (1, 4*Hp)    f32        VMEM  — b_ih + b_hh, fused gate layout
    # wlin_ref: (out, Hp)    f32        VMEM  — final Linear weight (lane-padded)
    # blin_ref: (out, 1)     f32        VMEM  — final Linear bias
    # out_ref:  (out, 1)     f32        VMEM  — predictions[-1]
    # xw_ref:   (C, 4*Hp)    f32        VMEM scratch — hoisted input term (chunked)
    L = x_ref.shape[0]
    Hp = whh_ref.shape[0]
    wdt = whh_ref.dtype
    chunk = xw_ref.shape[0]

    def sigmoid_eup(z):
        # sigmoid(z) == 0.5 * (tanh(0.5 z) + 1): single EUP op, VPU does the rest.
        return 0.5 * (jnp.tanh(0.5 * z) + 1.0)

    def step(t, carry):
        h, c = carry
        # Single fused (1,Hp) @ (Hp,4Hp) MXU pass (bf16 operands by default,
        # f32 accumulation either way).
        gates = jnp.dot(h.astype(wdt), whh_ref[...],
                        preferred_element_type=jnp.float32)
        gates = gates + xw_ref[pl.ds(t, 1), :]
        # Gate blocks are packed [i | f | o | g]: the three sigmoid
        # pre-activations are lane-contiguous -> one EUP call, plus one tanh.
        sig = sigmoid_eup(gates[:, 0:3 * Hp])
        g = jnp.tanh(gates[:, 3 * Hp:4 * Hp])
        i = sig[:, 0 * Hp:1 * Hp]
        f = sig[:, 1 * Hp:2 * Hp]
        o = sig[:, 2 * Hp:3 * Hp]
        c_new = f * c + i * g
        h_new = o * jnp.tanh(c_new)
        return (h_new, c_new)

    carry = (jnp.zeros((1, Hp), jnp.float32),   # h0
             jnp.zeros((1, Hp), jnp.float32))   # c0

    # Static Python loop over input chunks (single chunk for small L); each chunk
    # hoists x_t * W_ih + b once, then runs the serial recurrence over its rows.
    start = 0
    while start < L:
        cur = min(chunk, L - start)
        xw_ref[pl.ds(0, cur), :] = (x_ref[pl.ds(start, cur), :] * wih_ref[...]
                                    + b_ref[...])
        carry = lax.fori_loop(0, cur, step, carry,
                              unroll=max(1, min(8, cur)))
        start += cur
    h_T, _ = carry

    # predictions[-1] = Linear(lstm_out[-1]) as VPU multiply + lane reduction
    # (avoids an N=1 MXU latch on the epilogue); padded lanes of W_lin are zero.
    out_ref[...] = (jnp.sum(wlin_ref[...] * h_T, axis=-1, keepdims=True)
                    + blin_ref[...])


def lstm_predict(x, packed_params, xw_chunk=1024):
    """x: (L,) float32 series. Returns predictions[-1], shape (output_size,)."""
    wih, whh, b, wlin, blin = packed_params
    L = x.shape[0]
    g4 = whh.shape[1]              # 4 * Hp
    out_size = wlin.shape[0]

    chunk = min(L, xw_chunk)
    if chunk < L:
        chunk = max(8, (chunk // 8) * 8)   # keep chunk starts sublane-aligned

    out = pl.pallas_call(
        lstm_fwd_kernel,
        out_shape=jax.ShapeDtypeStruct((out_size, 1), jnp.float32),
        in_specs=[pl.BlockSpec(memory_space=pltpu.MemorySpace.VMEM)] * 6,
        out_specs=pl.BlockSpec(memory_space=pltpu.MemorySpace.VMEM),
        scratch_shapes=[pltpu.VMEM((chunk, g4), jnp.float32)],
    )(x.reshape(L, 1).astype(jnp.float32), wih, whh, b, wlin, blin)
    return out.reshape(-1)


# ---------------- parameter setup & packing ----------------

def init_params(key, input_size, hidden, output):
    """PyTorch-style uniform(-1/sqrt(H), 1/sqrt(H)) init."""
    k = 1.0 / jnp.sqrt(jnp.float32(hidden))
    ks = jax.random.split(key, 6)
    w_ih = jax.random.uniform(ks[0], (4 * hidden, input_size), jnp.float32, -k, k)
    w_hh = jax.random.uniform(ks[1], (4 * hidden, hidden), jnp.float32, -k, k)
    b_ih = jax.random.uniform(ks[2], (4 * hidden,), jnp.float32, -k, k)
    b_hh = jax.random.uniform(ks[3], (4 * hidden,), jnp.float32, -k, k)
    w_lin = jax.random.uniform(ks[4], (output, hidden), jnp.float32, -k, k)
    b_lin = jax.random.uniform(ks[5], (output,), jnp.float32, -k, k)
    return w_ih, w_hh, b_ih, b_hh, w_lin, b_lin


def pack_params(w_ih, w_hh, b_ih, b_hh, w_lin, b_lin, hidden, output,
                hp=128, recurrent_dtype=jnp.bfloat16):
    """Pack PyTorch LSTM params into fused, lane-dense, 128-padded layouts.

    Gate blocks are concatenated along the lane (last) axis in the order
    i, f, o, g (sigmoid gates first, contiguous); each block is Hp=128 lanes
    wide (zero-padded past `hidden`).  Zero padding is exact: padded lanes of
    h stay 0 through the recurrence.  W_hh defaults to bf16 (native MXU on
    v5e/v6e/v7x) with f32 accumulation; pass recurrent_dtype=jnp.float32 for a
    bit-accurate recurrence.
    """
    pad_h = hp - hidden
    perm = jnp.array([0, 1, 3, 2])                           # PyTorch i,f,g,o -> i,f,o,g
    wih_g = w_ih.reshape(4, hidden, -1)[:, :, 0][perm]       # (4, H)   input_size==1
    whh_g = w_hh.reshape(4, hidden, hidden)[perm]            # (4, H_out, H_in)
    b_g = (b_ih + b_hh).reshape(4, hidden)[perm]             # (4, H)

    wih_fused = jnp.pad(wih_g, ((0, 0), (0, pad_h))).reshape(1, 4 * hp)
    b_fused = jnp.pad(b_g, ((0, 0), (0, pad_h))).reshape(1, 4 * hp)

    whh_t = jnp.transpose(whh_g, (0, 2, 1))                  # (4, H_in, H_out): h @ W^T
    whh_pad = jnp.pad(whh_t, ((0, 0), (0, pad_h), (0, pad_h)))        # (4, Hp, Hp)
    whh_fused = jnp.transpose(whh_pad, (1, 0, 2)).reshape(hp, 4 * hp)
    whh_fused = whh_fused.astype(recurrent_dtype)

    wlin = jnp.pad(w_lin, ((0, 0), (0, pad_h)))               # (output, Hp)
    blin = b_lin.reshape(output, 1)                           # (output, 1)
    return wih_fused, whh_fused, b_fused, wlin, blin


# ---------------- pure-JAX reference (correctness check) ----------------

def lstm_ref(x, w_ih, w_hh, b_ih, b_hh, w_lin, b_lin, hidden):
    def step(carry, x_t):
        h, c = carry
        gates = w_ih @ jnp.reshape(x_t, (1,)) + w_hh @ h + b_ih + b_hh
        i, f, g, o = jnp.split(gates, 4)
        i = jax.nn.sigmoid(i)
        f = jax.nn.sigmoid(f)
        g = jnp.tanh(g)
        o = jax.nn.sigmoid(o)
        c = f * c + i * g
        h = o * jnp.tanh(c)
        return (h, c), h

    (h_T, _), _ = lax.scan(step, (jnp.zeros(hidden), jnp.zeros(hidden)), x)
    return w_lin @ h_T + b_lin


if __name__ == "__main__":
    SEQ = 8
    INPUT_SIZE, OUTPUT = 1, 1
    key = jax.random.PRNGKey(0)

    # Test the small demo size (32) and the module's default hidden size (100);
    # both are zero-padded to Hp=128 inside pack_params.
    for hidden in (32, 100):
        kp, kx = jax.random.split(jax.random.fold_in(key, hidden))
        raw = init_params(kp, INPUT_SIZE, hidden, OUTPUT)
        # input_seq: 1-D series of length SEQ (the module views it as (SEQ, 1, 1))
        input_seq = jax.random.normal(kx, (SEQ,), jnp.float32)
        ref = lstm_ref(input_seq, *raw, hidden)

        # f32 recurrent weights: tight match to the f32 reference.
        packed_f32 = pack_params(*raw, hidden, OUTPUT, recurrent_dtype=jnp.float32)
        pred = jax.block_until_ready(lstm_predict(input_seq, packed_f32))
        assert pred.shape == (OUTPUT,), pred.shape
        assert jnp.allclose(pred, ref, atol=1e-5, rtol=1e-5), (hidden, pred, ref)

        # bf16 recurrent weights (default packing; native MXU on all three gens),
        # f32 accumulation and f32 h/c state; looser tolerance vs f32 reference.
        packed_bf16 = pack_params(*raw, hidden, OUTPUT)
        pred_bf16 = jax.block_until_ready(lstm_predict(input_seq, packed_bf16))
        assert jnp.allclose(pred_bf16, ref, atol=5e-2, rtol=5e-2), (hidden, pred_bf16, ref)

    # Exercise the chunked-hoist path (multiple xw chunks) on a slightly longer
    # sequence; results must be identical to the single-chunk path.
    hidden = 32
    kp, kx = jax.random.split(jax.random.fold_in(key, 12345))
    raw = init_params(kp, INPUT_SIZE, hidden, OUTPUT)
    seq16 = jax.random.normal(kx, (16,), jnp.float32)
    ref16 = lstm_ref(seq16, *raw, hidden)
    packed = pack_params(*raw, hidden, OUTPUT, recurrent_dtype=jnp.float32)
    pred_one = jax.block_until_ready(lstm_predict(seq16, packed))              # 1 chunk
    pred_chk = jax.block_until_ready(lstm_predict(seq16, packed, xw_chunk=8))  # 2 chunks
    assert jnp.allclose(pred_one, ref16, atol=1e-5, rtol=1e-5), (pred_one, ref16)
    assert jnp.allclose(pred_chk, ref16, atol=1e-5, rtol=1e-5), (pred_chk, ref16)

    # TODO(synk): the nn.Module also carries self.hidden_cell across forward calls;
    # this kernel implements a single forward from the zero initial state.
    print("KERNEL_OK")
</pallas_src>

<mosaic_0001>
module attributes {stable_mosaic.version = 11 : i64} {
  func.func @lstm_fwd_kernel(%arg0: memref<8x1xf32, #tpu.memory_space<vmem>>, %arg1: memref<1x512xf32, #tpu.memory_space<vmem>>, %arg2: memref<128x512xf32, #tpu.memory_space<vmem>>, %arg3: memref<1x512xf32, #tpu.memory_space<vmem>>, %arg4: memref<1x128xf32, #tpu.memory_space<vmem>>, %arg5: memref<1x1xf32, #tpu.memory_space<vmem>>, %arg6: memref<1x1xf32, #tpu.memory_space<vmem>>, %arg7: memref<8x512xf32, #tpu.memory_space<vmem>>) attributes {dimension_semantics = [], scalar_prefetch = 0 : i64, scratch_operands = 1 : i64, tpu.core_type = #tpu.core_type<tc>} {
    %cst = arith.constant 0.000000e+00 : f32
    %0 = vector.broadcast %cst : f32 to vector<1x128xf32>
    %cst_0 = arith.constant 0.000000e+00 : f32
    %1 = vector.broadcast %cst_0 : f32 to vector<1x128xf32>
    %c0 = arith.constant 0 : index
    %c0_1 = arith.constant 0 : index
    %2 = vector.load %arg0[%c0, %c0_1] : memref<8x1xf32, #tpu.memory_space<vmem>>, vector<8x1xf32>
    %c0_2 = arith.constant 0 : index
    %c0_3 = arith.constant 0 : index
    %3 = vector.load %arg1[%c0_2, %c0_3] : memref<1x512xf32, #tpu.memory_space<vmem>>, vector<1x512xf32>
    %4 = vector.broadcast %2 : vector<8x1xf32> to vector<8x512xf32>
    %5 = vector.broadcast %3 : vector<1x512xf32> to vector<8x512xf32>
    %6 = arith.mulf %4, %5 : vector<8x512xf32>
    %c0_4 = arith.constant 0 : index
    %c0_5 = arith.constant 0 : index
    %7 = vector.load %arg3[%c0_4, %c0_5] : memref<1x512xf32, #tpu.memory_space<vmem>>, vector<1x512xf32>
    %8 = vector.broadcast %7 : vector<1x512xf32> to vector<8x512xf32>
    %9 = arith.addf %6, %8 : vector<8x512xf32>
    %c0_6 = arith.constant 0 : index
    %c0_7 = arith.constant 0 : index
    %10 = vector.load %arg7[%c0_6, %c0_7] : memref<8x512xf32, #tpu.memory_space<vmem>>, vector<8x512xf32>
    tpu.vector_store %arg7[%c0_6, %c0_7], %9 {strides = array<i32>} : memref<8x512xf32, #tpu.memory_space<vmem>>, vector<8x512xf32>,
    %c0_i32 = arith.constant 0 : i32
    %c0_8 = arith.constant 0 : index
    %c0_9 = arith.constant 0 : index
    %11 = vector.load %arg2[%c0_8, %c0_9] : memref<128x512xf32, #tpu.memory_space<vmem>>, vector<128x512xf32>
    %cst_10 = arith.constant dense<0.000000e+00> : vector<1x512xf32>
    %12 = tpu.matmul %0, %11, %cst_10 {dimension_numbers = #tpu.dot_dimension_numbers<[1], [0], [0], [1], [0, 0, 1, 1], [], []>} : vector<1x128xf32>, vector<128x512xf32>, vector<1x512xf32> -> vector<1x512xf32>
    %13 = arith.index_cast %c0_i32 : i32 to index
    %c0_11 = arith.constant 0 : index
    %14 = vector.load %arg7[%13, %c0_11] : memref<8x512xf32, #tpu.memory_space<vmem>>, vector<1x512xf32>
    %15 = arith.addf %12, %14 : vector<1x512xf32>
    %16 = vector.extract_strided_slice %15 {offsets = [0, 0], sizes = [1, 384], strides = [1, 1]} : vector<1x512xf32> to vector<1x384xf32>
    %cst_12 = arith.constant 5.000000e-01 : f32
    %17 = vector.broadcast %cst_12 : f32 to vector<1x384xf32>
    %18 = arith.mulf %17, %16 : vector<1x384xf32>
    %19 = math.tanh %18 : vector<1x384xf32>
    %cst_13 = arith.constant 1.000000e+00 : f32
    %20 = vector.broadcast %cst_13 : f32 to vector<1x384xf32>
    %21 = arith.addf %19, %20 : vector<1x384xf32>
    %cst_14 = arith.constant 5.000000e-01 : f32
    %22 = vector.broadcast %cst_14 : f32 to vector<1x384xf32>
    %23 = arith.mulf %22, %21 : vector<1x384xf32>
    %24 = vector.extract_strided_slice %15 {offsets = [0, 384], sizes = [1, 128], strides = [1, 1]} : vector<1x512xf32> to vector<1x128xf32>
    %25 = math.tanh %24 : vector<1x128xf32>
    %26 = vector.extract_strided_slice %23 {offsets = [0, 0], sizes = [1, 128], strides = [1, 1]} : vector<1x384xf32> to vector<1x128xf32>
    %27 = vector.extract_strided_slice %23 {offsets = [0, 128], sizes = [1, 128], strides = [1, 1]} : vector<1x384xf32> to vector<1x128xf32>
    %28 = vector.extract_strided_slice %23 {offsets = [0, 256], sizes = [1, 128], strides = [1, 1]} : vector<1x384xf32> to vector<1x128xf32>
    %29 = arith.mulf %27, %1 : vector<1x128xf32>
    %30 = arith.mulf %26, %25 : vector<1x128xf32>
    %31 = arith.addf %29, %30 : vector<1x128xf32>
    %32 = math.tanh %31 : vector<1x128xf32>
    %33 = arith.mulf %28, %32 : vector<1x128xf32>
    %c1_i32 = arith.constant 1 : i32
    %c0_15 = arith.constant 0 : index
    %c0_16 = arith.constant 0 : index
    %34 = vector.load %arg2[%c0_15, %c0_16] : memref<128x512xf32, #tpu.memory_space<vmem>>, vector<128x512xf32>
    %cst_17 = arith.constant dense<0.000000e+00> : vector<1x512xf32>
    %35 = tpu.matmul %33, %34, %cst_17 {dimension_numbers = #tpu.dot_dimension_numbers<[1], [0], [0], [1], [0, 0, 1, 1], [], []>} : vector<1x128xf32>, vector<128x512xf32>, vector<1x512xf32> -> vector<1x512xf32>
    %36 = arith.index_cast %c1_i32 : i32 to index
    %c0_18 = arith.constant 0 : index
    %37 = vector.load %arg7[%36, %c0_18] : memref<8x512xf32, #tpu.memory_space<vmem>>, vector<1x512xf32>
    %38 = arith.addf %35, %37 : vector<1x512xf32>
    %39 = vector.extract_strided_slice %38 {offsets = [0, 0], sizes = [1, 384], strides = [1, 1]} : vector<1x512xf32> to vector<1x384xf32>
    %cst_19 = arith.constant 5.000000e-01 : f32
    %40 = vector.broadcast %cst_19 : f32 to vector<1x384xf32>
    %41 = arith.mulf %40, %39 : vector<1x384xf32>
    %42 = math.tanh %41 : vector<1x384xf32>
    %cst_20 = arith.constant 1.000000e+00 : f32
    %43 = vector.broadcast %cst_20 : f32 to vector<1x384xf32>
    %44 = arith.addf %42, %43 : vector<1x384xf32>
    %cst_21 = arith.constant 5.000000e-01 : f32
    %45 = vector.broadcast %cst_21 : f32 to vector<1x384xf32>
    %46 = arith.mulf %45, %44 : vector<1x384xf32>
    %47 = vector.extract_strided_slice %38 {offsets = [0, 384], sizes = [1, 128], strides = [1, 1]} : vector<1x512xf32> to vector<1x128xf32>
    %48 = math.tanh %47 : vector<1x128xf32>
    %49 = vector.extract_strided_slice %46 {offsets = [0, 0], sizes = [1, 128], strides = [1, 1]} : vector<1x384xf32> to vector<1x128xf32>
    %50 = vector.extract_strided_slice %46 {offsets = [0, 128], sizes = [1, 128], strides = [1, 1]} : vector<1x384xf32> to vector<1x128xf32>
    %51 = vector.extract_strided_slice %46 {offsets = [0, 256], sizes = [1, 128], strides = [1, 1]} : vector<1x384xf32> to vector<1x128xf32>
    %52 = arith.mulf %50, %31 : vector<1x128xf32>
    %53 = arith.mulf %49, %48 : vector<1x128xf32>
    %54 = arith.addf %52, %53 : vector<1x128xf32>
    %55 = math.tanh %54 : vector<1x128xf32>
    %56 = arith.mulf %51, %55 : vector<1x128xf32>
    %c2_i32 = arith.constant 2 : i32
    %c0_22 = arith.constant 0 : index
    %c0_23 = arith.constant 0 : index
    %57 = vector.load %arg2[%c0_22, %c0_23] : memref<128x512xf32, #tpu.memory_space<vmem>>, vector<128x512xf32>
    %cst_24 = arith.constant dense<0.000000e+00> : vector<1x512xf32>
    %58 = tpu.matmul %56, %57, %cst_24 {dimension_numbers = #tpu.dot_dimension_numbers<[1], [0], [0], [1], [0, 0, 1, 1], [], []>} : vector<1x128xf32>, vector<128x512xf32>, vector<1x512xf32> -> vector<1x512xf32>
    %59 = arith.index_cast %c2_i32 : i32 to index
    %c0_25 = arith.constant 0 : index
    %60 = vector.load %arg7[%59, %c0_25] : memref<8x512xf32, #tpu.memory_space<vmem>>, vector<1x512xf32>
    %61 = arith.addf %58, %60 : vector<1x512xf32>
    %62 = vector.extract_strided_slice %61 {offsets = [0, 0], sizes = [1, 384], strides = [1, 1]} : vector<1x512xf32> to vector<1x384xf32>
    %cst_26 = arith.constant 5.000000e-01 : f32
    %63 = vector.broadcast %cst_26 : f32 to vector<1x384xf32>
    %64 = arith.mulf %63, %62 : vector<1x384xf32>
    %65 = math.tanh %64 : vector<1x384xf32>
    %cst_27 = arith.constant 1.000000e+00 : f32
    %66 = vector.broadcast %cst_27 : f32 to vector<1x384xf32>
    %67 = arith.addf %65, %66 : vector<1x384xf32>
    %cst_28 = arith.constant 5.000000e-01 : f32
    %68 = vector.broadcast %cst_28 : f32 to vector<1x384xf32>
    %69 = arith.mulf %68, %67 : vector<1x384xf32>
    %70 = vector.extract_strided_slice %61 {offsets = [0, 384], sizes = [1, 128], strides = [1, 1]} : vector<1x512xf32> to vector<1x128xf32>
    %71 = math.tanh %70 : vector<1x128xf32>
    %72 = vector.extract_strided_slice %69 {offsets = [0, 0], sizes = [1, 128], strides = [1, 1]} : vector<1x384xf32> to vector<1x128xf32>
    %73 = vector.extract_strided_slice %69 {offsets = [0, 128], sizes = [1, 128], strides = [1, 1]} : vector<1x384xf32> to vector<1x128xf32>
    %74 = vector.extract_strided_slice %69 {offsets = [0, 256], sizes = [1, 128], strides = [1, 1]} : vector<1x384xf32> to vector<1x128xf32>
    %75 = arith.mulf %73, %54 : vector<1x128xf32>
    %76 = arith.mulf %72, %71 : vector<1x128xf32>
    %77 = arith.addf %75, %76 : vector<1x128xf32>
    %78 = math.tanh %77 : vector<1x128xf32>
    %79 = arith.mulf %74, %78 : vector<1x128xf32>
    %c3_i32 = arith.constant 3 : i32
    %c0_29 = arith.constant 0 : index
    %c0_30 = arith.constant 0 : index
    %80 = vector.load %arg2[%c0_29, %c0_30] : memref<128x512xf32, #tpu.memory_space<vmem>>, vector<128x512xf32>
    %cst_31 = arith.constant dense<0.000000e+00> : vector<1x512xf32>
    %81 = tpu.matmul %79, %80, %cst_31 {dimension_numbers = #tpu.dot_dimension_numbers<[1], [0], [0], [1], [0, 0, 1, 1], [], []>} : vector<1x128xf32>, vector<128x512xf32>, vector<1x512xf32> -> vector<1x512xf32>
    %82 = arith.index_cast %c3_i32 : i32 to index
    %c0_32 = arith.constant 0 : index
    %83 = vector.load %arg7[%82, %c0_32] : memref<8x512xf32, #tpu.memory_space<vmem>>, vector<1x512xf32>
    %84 = arith.addf %81, %83 : vector<1x512xf32>
    %85 = vector.extract_strided_slice %84 {offsets = [0, 0], sizes = [1, 384], strides = [1, 1]} : vector<1x512xf32> to vector<1x384xf32>
    %cst_33 = arith.constant 5.000000e-01 : f32
    %86 = vector.broadcast %cst_33 : f32 to vector<1x384xf32>
    %87 = arith.mulf %86, %85 : vector<1x384xf32>
    %88 = math.tanh %87 : vector<1x384xf32>
    %cst_34 = arith.constant 1.000000e+00 : f32
    %89 = vector.broadcast %cst_34 : f32 to vector<1x384xf32>
    %90 = arith.addf %88, %89 : vector<1x384xf32>
    %cst_35 = arith.constant 5.000000e-01 : f32
    %91 = vector.broadcast %cst_35 : f32 to vector<1x384xf32>
    %92 = arith.mulf %91, %90 : vector<1x384xf32>
    %93 = vector.extract_strided_slice %84 {offsets = [0, 384], sizes = [1, 128], strides = [1, 1]} : vector<1x512xf32> to vector<1x128xf32>
    %94 = math.tanh %93 : vector<1x128xf32>
    %95 = vector.extract_strided_slice %92 {offsets = [0, 0], sizes = [1, 128], strides = [1, 1]} : vector<1x384xf32> to vector<1x128xf32>
    %96 = vector.extract_strided_slice %92 {offsets = [0, 128], sizes = [1, 128], strides = [1, 1]} : vector<1x384xf32> to vector<1x128xf32>
    %97 = vector.extract_strided_slice %92 {offsets = [0, 256], sizes = [1, 128], strides = [1, 1]} : vector<1x384xf32> to vector<1x128xf32>
    %98 = arith.mulf %96, %77 : vector<1x128xf32>
    %99 = arith.mulf %95, %94 : vector<1x128xf32>
    %100 = arith.addf %98, %99 : vector<1x128xf32>
    %101 = math.tanh %100 : vector<1x128xf32>
    %102 = arith.mulf %97, %101 : vector<1x128xf32>
    %c4_i32 = arith.constant 4 : i32
    %c0_36 = arith.constant 0 : index
    %c0_37 = arith.constant 0 : index
    %103 = vector.load %arg2[%c0_36, %c0_37] : memref<128x512xf32, #tpu.memory_space<vmem>>, vector<128x512xf32>
    %cst_38 = arith.constant dense<0.000000e+00> : vector<1x512xf32>
    %104 = tpu.matmul %102, %103, %cst_38 {dimension_numbers = #tpu.dot_dimension_numbers<[1], [0], [0], [1], [0, 0, 1, 1], [], []>} : vector<1x128xf32>, vector<128x512xf32>, vector<1x512xf32> -> vector<1x512xf32>
    %105 = arith.index_cast %c4_i32 : i32 to index
    %c0_39 = arith.constant 0 : index
    %106 = vector.load %arg7[%105, %c0_39] : memref<8x512xf32, #tpu.memory_space<vmem>>, vector<1x512xf32>
    %107 = arith.addf %104, %106 : vector<1x512xf32>
    %108 = vector.extract_strided_slice %107 {offsets = [0, 0], sizes = [1, 384], strides = [1, 1]} : vector<1x512xf32> to vector<1x384xf32>
    %cst_40 = arith.constant 5.000000e-01 : f32
    %109 = vector.broadcast %cst_40 : f32 to vector<1x384xf32>
    %110 = arith.mulf %109, %108 : vector<1x384xf32>
    %111 = math.tanh %110 : vector<1x384xf32>
    %cst_41 = arith.constant 1.000000e+00 : f32
    %112 = vector.broadcast %cst_41 : f32 to vector<1x384xf32>
    %113 = arith.addf %111, %112 : vector<1x384xf32>
    %cst_42 = arith.constant 5.000000e-01 : f32
    %114 = vector.broadcast %cst_42 : f32 to vector<1x384xf32>
    %115 = arith.mulf %114, %113 : vector<1x384xf32>
    %116 = vector.extract_strided_slice %107 {offsets = [0, 384], sizes = [1, 128], strides = [1, 1]} : vector<1x512xf32> to vector<1x128xf32>
    %117 = math.tanh %116 : vector<1x128xf32>
    %118 = vector.extract_strided_slice %115 {offsets = [0, 0], sizes = [1, 128], strides = [1, 1]} : vector<1x384xf32> to vector<1x128xf32>
    %119 = vector.extract_strided_slice %115 {offsets = [0, 128], sizes = [1, 128], strides = [1, 1]} : vector<1x384xf32> to vector<1x128xf32>
    %120 = vector.extract_strided_slice %115 {offsets = [0, 256], sizes = [1, 128], strides = [1, 1]} : vector<1x384xf32> to vector<1x128xf32>
    %121 = arith.mulf %119, %100 : vector<1x128xf32>
    %122 = arith.mulf %118, %117 : vector<1x128xf32>
    %123 = arith.addf %121, %122 : vector<1x128xf32>
    %124 = math.tanh %123 : vector<1x128xf32>
    %125 = arith.mulf %120, %124 : vector<1x128xf32>
    %c5_i32 = arith.constant 5 : i32
    %c0_43 = arith.constant 0 : index
    %c0_44 = arith.constant 0 : index
    %126 = vector.load %arg2[%c0_43, %c0_44] : memref<128x512xf32, #tpu.memory_space<vmem>>, vector<128x512xf32>
    %cst_45 = arith.constant dense<0.000000e+00> : vector<1x512xf32>
    %127 = tpu.matmul %125, %126, %cst_45 {dimension_numbers = #tpu.dot_dimension_numbers<[1], [0], [0], [1], [0, 0, 1, 1], [], []>} : vector<1x128xf32>, vector<128x512xf32>, vector<1x512xf32> -> vector<1x512xf32>
    %128 = arith.index_cast %c5_i32 : i32 to index
    %c0_46 = arith.constant 0 : index
    %129 = vector.load %arg7[%128, %c0_46] : memref<8x512xf32, #tpu.memory_space<vmem>>, vector<1x512xf32>
    %130 = arith.addf %127, %129 : vector<1x512xf32>
    %131 = vector.extract_strided_slice %130 {offsets = [0, 0], sizes = [1, 384], strides = [1, 1]} : vector<1x512xf32> to vector<1x384xf32>
    %cst_47 = arith.constant 5.000000e-01 : f32
    %132 = vector.broadcast %cst_47 : f32 to vector<1x384xf32>
    %133 = arith.mulf %132, %131 : vector<1x384xf32>
    %134 = math.tanh %133 : vector<1x384xf32>
    %cst_48 = arith.constant 1.000000e+00 : f32
    %135 = vector.broadcast %cst_48 : f32 to vector<1x384xf32>
    %136 = arith.addf %134, %135 : vector<1x384xf32>
    %cst_49 = arith.constant 5.000000e-01 : f32
    %137 = vector.broadcast %cst_49 : f32 to vector<1x384xf32>
    %138 = arith.mulf %137, %136 : vector<1x384xf32>
    %139 = vector.extract_strided_slice %130 {offsets = [0, 384], sizes = [1, 128], strides = [1, 1]} : vector<1x512xf32> to vector<1x128xf32>
    %140 = math.tanh %139 : vector<1x128xf32>
    %141 = vector.extract_strided_slice %138 {offsets = [0, 0], sizes = [1, 128], strides = [1, 1]} : vector<1x384xf32> to vector<1x128xf32>
    %142 = vector.extract_strided_slice %138 {offsets = [0, 128], sizes = [1, 128], strides = [1, 1]} : vector<1x384xf32> to vector<1x128xf32>
    %143 = vector.extract_strided_slice %138 {offsets = [0, 256], sizes = [1, 128], strides = [1, 1]} : vector<1x384xf32> to vector<1x128xf32>
    %144 = arith.mulf %142, %123 : vector<1x128xf32>
    %145 = arith.mulf %141, %140 : vector<1x128xf32>
    %146 = arith.addf %144, %145 : vector<1x128xf32>
    %147 = math.tanh %146 : vector<1x128xf32>
    %148 = arith.mulf %143, %147 : vector<1x128xf32>
    %c6_i32 = arith.constant 6 : i32
    %c0_50 = arith.constant 0 : index
    %c0_51 = arith.constant 0 : index
    %149 = vector.load %arg2[%c0_50, %c0_51] : memref<128x512xf32, #tpu.memory_space<vmem>>, vector<128x512xf32>
    %cst_52 = arith.constant dense<0.000000e+00> : vector<1x512xf32>
    %150 = tpu.matmul %148, %149, %cst_52 {dimension_numbers = #tpu.dot_dimension_numbers<[1], [0], [0], [1], [0, 0, 1, 1], [], []>} : vector<1x128xf32>, vector<128x512xf32>, vector<1x512xf32> -> vector<1x512xf32>
    %151 = arith.index_cast %c6_i32 : i32 to index
    %c0_53 = arith.constant 0 : index
    %152 = vector.load %arg7[%151, %c0_53] : memref<8x512xf32, #tpu.memory_space<vmem>>, vector<1x512xf32>
    %153 = arith.addf %150, %152 : vector<1x512xf32>
    %154 = vector.extract_strided_slice %153 {offsets = [0, 0], sizes = [1, 384], strides = [1, 1]} : vector<1x512xf32> to vector<1x384xf32>
    %cst_54 = arith.constant 5.000000e-01 : f32
    %155 = vector.broadcast %cst_54 : f32 to vector<1x384xf32>
    %156 = arith.mulf %155, %154 : vector<1x384xf32>
    %157 = math.tanh %156 : vector<1x384xf32>
    %cst_55 = arith.constant 1.000000e+00 : f32
    %158 = vector.broadcast %cst_55 : f32 to vector<1x384xf32>
    %159 = arith.addf %157, %158 : vector<1x384xf32>
    %cst_56 = arith.constant 5.000000e-01 : f32
    %160 = vector.broadcast %cst_56 : f32 to vector<1x384xf32>
    %161 = arith.mulf %160, %159 : vector<1x384xf32>
    %162 = vector.extract_strided_slice %153 {offsets = [0, 384], sizes = [1, 128], strides = [1, 1]} : vector<1x512xf32> to vector<1x128xf32>
    %163 = math.tanh %162 : vector<1x128xf32>
    %164 = vector.extract_strided_slice %161 {offsets = [0, 0], sizes = [1, 128], strides = [1, 1]} : vector<1x384xf32> to vector<1x128xf32>
    %165 = vector.extract_strided_slice %161 {offsets = [0, 128], sizes = [1, 128], strides = [1, 1]} : vector<1x384xf32> to vector<1x128xf32>
    %166 = vector.extract_strided_slice %161 {offsets = [0, 256], sizes = [1, 128], strides = [1, 1]} : vector<1x384xf32> to vector<1x128xf32>
    %167 = arith.mulf %165, %146 : vector<1x128xf32>
    %168 = arith.mulf %164, %163 : vector<1x128xf32>
    %169 = arith.addf %167, %168 : vector<1x128xf32>
    %170 = math.tanh %169 : vector<1x128xf32>
    %171 = arith.mulf %166, %170 : vector<1x128xf32>
    %c7_i32 = arith.constant 7 : i32
    %c0_57 = arith.constant 0 : index
    %c0_58 = arith.constant 0 : index
    %172 = vector.load %arg2[%c0_57, %c0_58] : memref<128x512xf32, #tpu.memory_space<vmem>>, vector<128x512xf32>
    %cst_59 = arith.constant dense<0.000000e+00> : vector<1x512xf32>
    %173 = tpu.matmul %171, %172, %cst_59 {dimension_numbers = #tpu.dot_dimension_numbers<[1], [0], [0], [1], [0, 0, 1, 1], [], []>} : vector<1x128xf32>, vector<128x512xf32>, vector<1x512xf32> -> vector<1x512xf32>
    %174 = arith.index_cast %c7_i32 : i32 to index
    %c0_60 = arith.constant 0 : index
    %175 = vector.load %arg7[%174, %c0_60] : memref<8x512xf32, #tpu.memory_space<vmem>>, vector<1x512xf32>
    %176 = arith.addf %173, %175 : vector<1x512xf32>
    %177 = vector.extract_strided_slice %176 {offsets = [0, 0], sizes = [1, 384], strides = [1, 1]} : vector<1x512xf32> to vector<1x384xf32>
    %cst_61 = arith.constant 5.000000e-01 : f32
    %178 = vector.broadcast %cst_61 : f32 to vector<1x384xf32>
    %179 = arith.mulf %178, %177 : vector<1x384xf32>
    %180 = math.tanh %179 : vector<1x384xf32>
    %cst_62 = arith.constant 1.000000e+00 : f32
    %181 = vector.broadcast %cst_62 : f32 to vector<1x384xf32>
    %182 = arith.addf %180, %181 : vector<1x384xf32>
    %cst_63 = arith.constant 5.000000e-01 : f32
    %183 = vector.broadcast %cst_63 : f32 to vector<1x384xf32>
    %184 = arith.mulf %183, %182 : vector<1x384xf32>
    %185 = vector.extract_strided_slice %176 {offsets = [0, 384], sizes = [1, 128], strides = [1, 1]} : vector<1x512xf32> to vector<1x128xf32>
    %186 = math.tanh %185 : vector<1x128xf32>
    %187 = vector.extract_strided_slice %184 {offsets = [0, 0], sizes = [1, 128], strides = [1, 1]} : vector<1x384xf32> to vector<1x128xf32>
    %188 = vector.extract_strided_slice %184 {offsets = [0, 128], sizes = [1, 128], strides = [1, 1]} : vector<1x384xf32> to vector<1x128xf32>
    %189 = vector.extract_strided_slice %184 {offsets = [0, 256], sizes = [1, 128], strides = [1, 1]} : vector<1x384xf32> to vector<1x128xf32>
    %190 = arith.mulf %188, %169 : vector<1x128xf32>
    %191 = arith.mulf %187, %186 : vector<1x128xf32>
    %192 = arith.addf %190, %191 : vector<1x128xf32>
    %193 = math.tanh %192 : vector<1x128xf32>
    %194 = arith.mulf %189, %193 : vector<1x128xf32>
    %c8_i32 = arith.constant 8 : i32
    %c0_64 = arith.constant 0 : index
    %c0_65 = arith.constant 0 : index
    %195 = vector.load %arg4[%c0_64, %c0_65] : memref<1x128xf32, #tpu.memory_space<vmem>>, vector<1x128xf32>
    %196 = arith.mulf %195, %194 : vector<1x128xf32>
    %cst_66 = arith.constant dense<0.000000e+00> : vector<1xf32>
    %197 = vector.multi_reduction <add>, %196, %cst_66 [1] : vector<1x128xf32> to vector<1xf32>
    %198 = vector.shape_cast %197 : vector<1xf32> to vector<1x1xf32>
    %c0_67 = arith.constant 0 : index
    %c0_68 = arith.constant 0 : index
    %199 = vector.load %arg5[%c0_67, %c0_68] : memref<1x1xf32, #tpu.memory_space<vmem>>, vector<1x1xf32>
    %200 = arith.addf %198, %199 : vector<1x1xf32>
    %c0_69 = arith.constant 0 : index
    %c0_70 = arith.constant 0 : index
    %201 = vector.load %arg6[%c0_69, %c0_70] : memref<1x1xf32, #tpu.memory_space<vmem>>, vector<1x1xf32>
    tpu.vector_store %arg6[%c0_69, %c0_70], %200 {strides = array<i32>} : memref<1x1xf32, #tpu.memory_space<vmem>>, vector<1x1xf32>,
    return
  }
}

</mosaic_0001>

<bundles_post_ra>
// kernel: tpu_custom_call.1
= control target key start
LH: loop header
LB: loop body
LE: loop exit
PB: predicated region body
PF: predicated region fallthrough
CT: control target
= control target key end

     0   :  { %s2769_s0 = inlined_call_operand.vmem [shape: f32[8,1], index: 0, kind: input, shape index: {}]   ;;  %s2770_s1 = inlined_call_operand.vmem [shape: f32[1,512], index: 1, kind: input, shape index: {}]   ;;  %s2771_s2 = inlined_call_operand.hbm [shape: f32[128,512], index: 2, kind: input, shape index: {}]   ;;  %s2772_s3 = inlined_call_operand.vmem [shape: f32[1,512], index: 3, kind: input, shape index: {}]   ;;  %s2773_s4 = inlined_call_operand.vmem [shape: f32[1,128], index: 4, kind: input, shape index: {}]   ;;  %s2774_s5 = inlined_call_operand.<no memory space> [shape: f32[1,1], index: 5, kind: input, shape index: {}]   ;;  %s2775_s6 = inlined_call_operand.hbm [shape: f32[1,1], index: 6, kind: output, shape index: {}]  }
   0x1   :  { %v11_v0 = vstv %s2774_s5 }
   0x2   :  { %12 = vst [vmem:[#allocation3] sm:$0x1] %v11_v0 }
   0x3   :  { %13 = vsyncpa [#allocation5], 0 }
   0x4   :  { %14 = vsyncpa [#allocation6], 0  ;;  %s1849_s23 = smov [#allocation4]  }
   0x5   :  { %s24_s24 = sshll.u32 %s1849_s23, 4  ;;  %s25_s24 = int_to_ptr.vmem [resolvable:$true] %s24_s24 }
   0x6   :  { %s1813_s25 = scalar_lea.vmem %s25_s24, 8192  ;;  %p1818_p1 = scmp.lt.s32.totalorder %s25_s24, %s25_s24 }
   0x7   :  { %p1814_p0 = scmp.ne.s32.totalorder %s25_s24, %s1813_s25  ;;  %p1819_p2 = scmp.lt.s32.totalorder %s1813_s25, %s1813_s25 }
   0x9   :  { %p1820_p3 = por %p1819_p2, %p1818_p1 }
   0xb   :  { %p1821_p4 = pnand %p1820_p3, %p1814_p0 }
   0xd   :  { %1824 = shalt.err (!%p1821_p4)
}
   0xe   :  { %s1850_s26 = smov 512   ;;  %s1851_s27 = smov 32  }
   0xf   :  { %30 = dma.hbm_to_vmem [thread:$0]  %s2771_s2, 8192, %s25_s24, [#allocation5], %s1850_s26, %s1850_s26, %s1851_s27  }
  0x10   :  { %1845 = dma.done.wait [#allocation5], 8192  }
  0x11   :  { %1846 = vsyncadd [#allocation5], 4294959104  ;;  %v2776_v1 = vmov 0.0   ;;  %v1853_v2 = vmov 0   ;;  %v1898_v3 = vld [vmem:[#allocation4 + $0x1e8] sm:$0xff]  ;;  %v1900_v4 = vld [vmem:[#allocation4 + $0x1f8] sm:$0xff] }
  0x12   :  { %252 = vmatprep.mubr.f32.mxu0 %v2776_v1  ;;  %323 = vmatprep.mubr.f32.mxu1 %v2776_v1  ;;  %2885 = vst [vmem:[#allocation10_spill] sm:$0xff] %v1898_v3  ;;  %2886 = vst [vmem:[#allocation11_spill] sm:$0xff] %v1900_v4  ;;  %v1902_v5 = vld [vmem:[#allocation4 + $0x1e0] sm:$0xff]  ;;  %v1906_v6 = vld [vmem:[#allocation4 + $0x1f0] sm:$0xff]  ;;  %vm1631_vm0 = vcmask 1040384   ;;  %s1854_s9 = smov [#allocation7]  }
  0x13   :  { %1660 = vset.pattern.permute.xlu0 %v1853_v2  ;;  %188 = vmatprep.subr.mxu0 %v1898_v3  ;;  %v1908_v7 = vld [vmem:[#allocation4 + $0x1c8] sm:$0xff]  ;;  %v1910_v8 = vld [vmem:[#allocation4 + $0x1d8] sm:$0xff]  ;;  %v1914_v9 = vld [vmem:[#allocation4 + $0x1c0] sm:$0xff]  ;;  %s1645_s10 = sshll.u32 %s1854_s9, 4  ;;  %vm1637_vm1 = vcmask 0   ;;  %s1646_s10 = int_to_ptr.vmem [resolvable:$true] %s1645_s10 }
  0x14   :  { %259 = vmatprep.subr.mxu1 %v1900_v4  ;;  %189 = vmatpush1.msra.mxu0 %v1902_v5  ;;  %v1916_v10 = vld [vmem:[#allocation4 + $0x1d0] sm:$0xff]  ;;  %v1918_v11 = vld [vmem:[#allocation4 + $0x1a8] sm:$0xff]  ;;  %v1922_v12 = vld [vmem:[#allocation4 + $0x1b8] sm:$0xff]  ;;  %s1825_s11 = scalar_lea.vmem %s1646_s10, 16  ;;  %s1829_s12 = scalar_lea.vmem %s1646_s10, 32 }
  0x15   :  { %260 = vmatpush1.msra.mxu1 %v1906_v6  ;;  %190 = vmatprep.subr.mxu0 %v1908_v7  ;;  %v1924_v13 = vld [vmem:[#allocation4 + $0x1a0] sm:$0xff]  ;;  %v1926_v14 = vld [vmem:[#allocation4 + $0x1b0] sm:$0xff]  ;;  %v1930_v15 = vld [vmem:[#allocation4 + $0x188] sm:$0xff]  ;;  %p1826_p5 = scmp.ne.s32.totalorder %s1646_s10, %s1825_s11  ;;  %p1830_p6 = scmp.lt.s32.totalorder %s1646_s10, %s1646_s10 }
  0x16   :  { %261 = vmatprep.subr.mxu1 %v1910_v8  ;;  %191 = vmatpush1.msra.mxu0 %v1914_v9  ;;  %v1932_v16 = vld [vmem:[#allocation4 + $0x198] sm:$0xff]  ;;  %v1936_v17 = vld [vmem:[#allocation4 + $0x180] sm:$0xff]  ;;  %v1938_v18 = vld [vmem:[#allocation4 + $0x190] sm:$0xff]  ;;  %p1831_p7 = scmp.lt.s32.totalorder %s1829_s12, %s1825_s11 }
  0x17   :  { %262 = vmatpush1.msra.mxu1 %v1916_v10  ;;  %192 = vmatprep.subr.mxu0 %v1918_v11  ;;  %v1942_v19 = vld [vmem:[#allocation4 + $0x168] sm:$0xff]  ;;  %v1944_v20 = vld [vmem:[#allocation4 + $0x178] sm:$0xff]  ;;  %v1948_v21 = vld [vmem:[#allocation4 + $0x160] sm:$0xff] }
  0x18   :  { %263 = vmatprep.subr.mxu1 %v1922_v12  ;;  %193 = vmatpush1.msra.mxu0 %v1924_v13  ;;  %v1950_v22 = vld [vmem:[#allocation4 + $0x170] sm:$0xff]  ;;  %v1954_v23 = vld [vmem:[#allocation4 + $0x148] sm:$0xff]  ;;  %v1956_v24 = vld [vmem:[#allocation4 + $0x158] sm:$0xff]  ;;  %p1832_p8 = por %p1831_p7, %p1830_p6 }
  0x19   :  { %264 = vmatpush1.msra.mxu1 %v1926_v14  ;;  %194 = vmatprep.subr.mxu0 %v1930_v15  ;;  %v1960_v25 = vld [vmem:[#allocation4 + $0x140] sm:$0xff]  ;;  %v1962_v26 = vld [vmem:[#allocation4 + $0x150] sm:$0xff]  ;;  %v1966_v27 = vld [vmem:[#allocation4 + $0x128] sm:$0xff] }
  0x1a   :  { %265 = vmatprep.subr.mxu1 %v1932_v16  ;;  %195 = vmatpush1.msra.mxu0 %v1936_v17  ;;  %v1968_v28 = vld [vmem:[#allocation4 + $0x138] sm:$0xff]  ;;  %v1972_v29 = vld [vmem:[#allocation4 + $0x120] sm:$0xff]  ;;  %v1974_v30 = vld [vmem:[#allocation4 + $0x130] sm:$0xff]  ;;  %p1833_p9 = pnand %p1832_p8, %p1826_p5 }
  0x1b   :  { %266 = vmatpush1.msra.mxu1 %v1938_v18  ;;  %196 = vmatprep.subr.mxu0 %v1942_v19  ;;  %v1978_v31 = vld [vmem:[#allocation4 + $0x108] sm:$0xff]  ;;  %v1980_v32 = vld [vmem:[#allocation4 + $0x118] sm:$0xff]  ;;  %v1984_v33 = vld [vmem:[#allocation4 + $0x100] sm:$0xff] }
  0x1c   :  { %267 = vmatprep.subr.mxu1 %v1944_v20  ;;  %197 = vmatpush1.msra.mxu0 %v1948_v21  ;;  %v1986_v34 = vld [vmem:[#allocation4 + $0x110] sm:$0xff]  ;;  %v1990_v35 = vld [vmem:[#allocation4 + $0xe8] sm:$0xff]  ;;  %v1992_v36 = vld [vmem:[#allocation4 + $0xf8] sm:$0xff] }
  0x1d   :  { %268 = vmatpush1.msra.mxu1 %v1950_v22  ;;  %198 = vmatprep.subr.mxu0 %v1954_v23  ;;  %v1996_v37 = vld [vmem:[#allocation4 + $0xe0] sm:$0xff]  ;;  %v1998_v38 = vld [vmem:[#allocation4 + $0xf0] sm:$0xff]  ;;  %v2002_v39 = vld [vmem:[#allocation4 + $0xc8] sm:$0xff] }
  0x1e   :  { %269 = vmatprep.subr.mxu1 %v1956_v24  ;;  %199 = vmatpush1.msra.mxu0 %v1960_v25  ;;  %v2004_v40 = vld [vmem:[#allocation4 + $0xd8] sm:$0xff]  ;;  %v2008_v41 = vld [vmem:[#allocation4 + $0xc0] sm:$0xff]  ;;  %v2010_v42 = vld [vmem:[#allocation4 + $0xd0] sm:$0xff] }
  0x1f   :  { %270 = vmatpush1.msra.mxu1 %v1962_v26  ;;  %200 = vmatprep.subr.mxu0 %v1966_v27  ;;  %2887 = vst [vmem:[#allocation12_spill] sm:$0xff] %v2010_v42  ;;  %v2014_v43 = vld [vmem:[#allocation4 + $0xa8] sm:$0xff]  ;;  %v2016_v44 = vld [vmem:[#allocation4 + $0xb8] sm:$0xff]  ;;  %v2020_v45 = vld [vmem:[#allocation4 + $0xa0] sm:$0xff] }
  0x20   :  { %271 = vmatprep.subr.mxu1 %v1968_v28  ;;  %201 = vmatpush1.msra.mxu0 %v1972_v29  ;;  %2888 = vst [vmem:[#allocation13_spill] sm:$0xff] %v2014_v43  ;;  %2889 = vst [vmem:[#allocation14_spill] sm:$0xff] %v2016_v44  ;;  %v2022_v46 = vld [vmem:[#allocation4 + $0xb0] sm:$0xff]  ;;  %v2026_v47 = vld [vmem:[#allocation4 + $0x88] sm:$0xff] }
  0x21   :  { %272 = vmatpush1.msra.mxu1 %v1974_v30  ;;  %202 = vmatprep.subr.mxu0 %v1978_v31  ;;  %2890 = vst [vmem:[#allocation15_spill] sm:$0xff] %v2020_v45  ;;  %2891 = vst [vmem:[#allocation16_spill] sm:$0xff] %v2022_v46  ;;  %v2028_v48 = vld [vmem:[#allocation4 + $0x98] sm:$0xff]  ;;  %v2032_v49 = vld [vmem:[#allocation4 + $0x80] sm:$0xff] }
  0x22   :  { %273 = vmatprep.subr.mxu1 %v1980_v32  ;;  %203 = vmatpush1.msra.mxu0 %v1984_v33  ;;  %2892 = vst [vmem:[#allocation17_spill] sm:$0xff] %v2026_v47  ;;  %2893 = vst [vmem:[#allocation18_spill] sm:$0xff] %v2028_v48  ;;  %v2034_v50 = vld [vmem:[#allocation4 + $0x90] sm:$0xff]  ;;  %v2038_v51 = vld [vmem:[#allocation4 + $0x68] sm:$0xff] }
  0x23   :  { %274 = vmatpush1.msra.mxu1 %v1986_v34  ;;  %204 = vmatprep.subr.mxu0 %v1990_v35  ;;  %2894 = vst [vmem:[#allocation19_spill] sm:$0xff] %v2032_v49  ;;  %2895 = vst [vmem:[#allocation20_spill] sm:$0xff] %v2034_v50  ;;  %v2040_v52 = vld [vmem:[#allocation4 + $0x78] sm:$0xff]  ;;  %v2044_v53 = vld [vmem:[#allocation4 + $0x60] sm:$0xff] }
  0x24   :  { %275 = vmatprep.subr.mxu1 %v1992_v36  ;;  %205 = vmatpush1.msra.mxu0 %v1996_v37  ;;  %2896 = vst [vmem:[#allocation21_spill] sm:$0xff] %v2038_v51  ;;  %2897 = vst [vmem:[#allocation22_spill] sm:$0xff] %v2040_v52  ;;  %v2046_v54 = vld [vmem:[#allocation4 + $0x70] sm:$0xff]  ;;  %v2050_v55 = vld [vmem:[#allocation4 + $0x48] sm:$0xff] }
  0x25   :  { %276 = vmatpush1.msra.mxu1 %v1998_v38  ;;  %206 = vmatprep.subr.mxu0 %v2002_v39  ;;  %2898 = vst [vmem:[#allocation23_spill] sm:$0xff] %v2044_v53  ;;  %2899 = vst [vmem:[#allocation24_spill] sm:$0xff] %v2046_v54  ;;  %v2052_v56 = vld [vmem:[#allocation4 + $0x58] sm:$0xff]  ;;  %v2056_v57 = vld [vmem:[#allocation4 + $0x40] sm:$0xff] }
  0x26   :  { %277 = vmatprep.subr.mxu1 %v2004_v40  ;;  %207 = vmatpush1.msra.mxu0 %v2008_v41  ;;  %2900 = vst [vmem:[#allocation25_spill] sm:$0xff] %v2050_v55  ;;  %2901 = vst [vmem:[#allocation26_spill] sm:$0xff] %v2052_v56  ;;  %v2058_v58 = vld [vmem:[#allocation4 + $0x50] sm:$0xff]  ;;  %v2062_v59 = vld [vmem:[#allocation4 + $0x28] sm:$0xff] }
  0x27   :  { %278 = vmatpush1.msra.mxu1 %v2010_v42  ;;  %208 = vmatprep.subr.mxu0 %v2014_v43  ;;  %2902 = vst [vmem:[#allocation27_spill] sm:$0xff] %v2056_v57  ;;  %2903 = vst [vmem:[#allocation28_spill] sm:$0xff] %v2058_v58  ;;  %v2064_v60 = vld [vmem:[#allocation4 + $0x38] sm:$0xff]  ;;  %v2068_v61 = vld [vmem:[#allocation4 + $0x20] sm:$0xff] }
  0x28   :  { %279 = vmatprep.subr.mxu1 %v2016_v44  ;;  %209 = vmatpush1.msra.mxu0 %v2020_v45  ;;  %2904 = vst [vmem:[#allocation29_spill] sm:$0xff] %v2062_v59  ;;  %2905 = vst [vmem:[#allocation30_spill] sm:$0xff] %v2064_v60  ;;  %v2070_v62 = vld [vmem:[#allocation4 + $0x30] sm:$0xff]  ;;  %v2074_v63 = vld [vmem:[#allocation4 + $0x8] sm:$0xff] }
  0x29   :  { %280 = vmatpush1.msra.mxu1 %v2022_v46  ;;  %210 = vmatprep.subr.mxu0 %v2026_v47  ;;  %2906 = vst [vmem:[#allocation31_spill] sm:$0xff] %v2068_v61  ;;  %2907 = vst [vmem:[#allocation32_spill] sm:$0xff] %v2070_v62  ;;  %v2076_v0 = vld [vmem:[#allocation4 + $0x18] sm:$0xff]  ;;  %v2080_v2 = vld [vmem:[#allocation4] sm:$0xff] }
  0x2a   :  { %281 = vmatprep.subr.mxu1 %v2028_v48  ;;  %211 = vmatpush1.msra.mxu0 %v2032_v49  ;;  %2908 = vst [vmem:[#allocation33_spill] sm:$0xff] %v2074_v63  ;;  %2909 = vst [vmem:[#allocation34_spill] sm:$0xff] %v2076_v0  ;;  %v2082_v1 = vld [vmem:[#allocation4 + $0x10] sm:$0xff] }
  0x2b   :  { %282 = vmatpush1.msra.mxu1 %v2034_v50  ;;  %212 = vmatprep.subr.mxu0 %v2038_v51  ;;  %2910 = vst [vmem:[#allocation35_spill] sm:$0xff] %v2080_v2  ;;  %2911 = vst [vmem:[#allocation36_spill] sm:$0xff] %v2082_v1 }
  0x2c   :  { %283 = vmatprep.subr.mxu1 %v2040_v52  ;;  %213 = vmatpush1.msra.mxu0 %v2044_v53 }
  0x2d   :  { %284 = vmatpush1.msra.mxu1 %v2046_v54  ;;  %214 = vmatprep.subr.mxu0 %v2050_v55 }
  0x2e   :  { %285 = vmatprep.subr.mxu1 %v2052_v56  ;;  %215 = vmatpush1.msra.mxu0 %v2056_v57 }
  0x2f   :  { %286 = vmatpush1.msra.mxu1 %v2058_v58  ;;  %216 = vmatprep.subr.mxu0 %v2062_v59  ;;  %v40_v58 = vld [vmem:[%s2769_s0] sm:$0xff] }
  0x30   :  { %287 = vmatprep.subr.mxu1 %v2064_v60  ;;  %217 = vmatpush1.msra.mxu0 %v2068_v61  ;;  %v2912_v60 = vmov 0.0  }
  0x31   :  { %288 = vmatpush1.msra.mxu1 %v2070_v62  ;;  %218 = vmatprep.subr.mxu0 %v2074_v63 }
  0x32   :  { %289 = vmatprep.subr.mxu1 %v2076_v0  ;;  %219 = vmatpush1.msra.mxu0 %v2080_v2 }
  0x33   :  { %290 = vmatpush1.msra.mxu1 %v2082_v1  ;;  %253 = vmatmul.mubr.f32.vlgmr.msra.gmra.mxu0 %v2912_v60 }
  0x34   :  { %324 = vmatmul.mubr.f32.vlgmr.msra.gmra.mxu1 %v2912_v60  ;;  %44 = vperm.xlu0 %1660, %v40_v58   ;;  %v2913_v58 = vld [vmem:[#allocation28_spill] sm:$0xff] }
  0x35   :  { %371 = vmatprep.subr.mxu0 %v1898_v3  ;;  %442 = vmatprep.subr.mxu1 %v1900_v4 }
  0x36   :  { %372 = vmatpush1.msra.mxu0 %v1902_v5  ;;  %443 = vmatpush1.msra.mxu1 %v1906_v6 }
  0x37   :  { %373 = vmatprep.subr.mxu0 %v1908_v7  ;;  %444 = vmatprep.subr.mxu1 %v1910_v8 }
  0x38   :  { %374 = vmatpush1.msra.mxu0 %v1914_v9  ;;  %445 = vmatpush1.msra.mxu1 %v1916_v10 }
  0x39   :  { %375 = vmatprep.subr.mxu0 %v1918_v11  ;;  %446 = vmatprep.subr.mxu1 %v1922_v12 }
  0x3a   :  { %376 = vmatpush1.msra.mxu0 %v1924_v13  ;;  %447 = vmatpush1.msra.mxu1 %v1926_v14 }
  0x3b   :  { %377 = vmatprep.subr.mxu0 %v1930_v15  ;;  %448 = vmatprep.subr.mxu1 %v1932_v16 }
  0x3c   :  { %378 = vmatpush1.msra.mxu0 %v1936_v17  ;;  %449 = vmatpush1.msra.mxu1 %v1938_v18 }
  0x3d   :  { %379 = vmatprep.subr.mxu0 %v1942_v19  ;;  %450 = vmatprep.subr.mxu1 %v1944_v20 }
  0x3e   :  { %380 = vmatpush1.msra.mxu0 %v1948_v21  ;;  %451 = vmatpush1.msra.mxu1 %v1950_v22 }
  0x3f   :  { %381 = vmatprep.subr.mxu0 %v1954_v23  ;;  %452 = vmatprep.subr.mxu1 %v1956_v24 }
  0x40   :  { %382 = vmatpush1.msra.mxu0 %v1960_v25  ;;  %453 = vmatpush1.msra.mxu1 %v1962_v26 }
  0x41   :  { %383 = vmatprep.subr.mxu0 %v1966_v27  ;;  %454 = vmatprep.subr.mxu1 %v1968_v28 }
  0x42   :  { %384 = vmatpush1.msra.mxu0 %v1972_v29  ;;  %455 = vmatpush1.msra.mxu1 %v1974_v30 }
  0x43   :  { %385 = vmatprep.subr.mxu0 %v1978_v31  ;;  %456 = vmatprep.subr.mxu1 %v1980_v32 }
  0x44   :  { %386 = vmatpush1.msra.mxu0 %v1984_v33  ;;  %457 = vmatpush1.msra.mxu1 %v1986_v34 }
  0x45   :  { %387 = vmatprep.subr.mxu0 %v1990_v35  ;;  %458 = vmatprep.subr.mxu1 %v1992_v36 }
  0x46   :  { %388 = vmatpush1.msra.mxu0 %v1996_v37  ;;  %459 = vmatpush1.msra.mxu1 %v1998_v38 }
  0x47   :  { %389 = vmatprep.subr.mxu0 %v2002_v39  ;;  %460 = vmatprep.subr.mxu1 %v2004_v40 }
  0x48   :  { %390 = vmatpush1.msra.mxu0 %v2008_v41  ;;  %461 = vmatpush1.msra.mxu1 %v2010_v42 }
  0x49   :  { %391 = vmatprep.subr.mxu0 %v2014_v43  ;;  %462 = vmatprep.subr.mxu1 %v2016_v44 }
  0x4a   :  { %392 = vmatpush1.msra.mxu0 %v2020_v45  ;;  %463 = vmatpush1.msra.mxu1 %v2022_v46 }
  0x4b   :  { %393 = vmatprep.subr.mxu0 %v2026_v47  ;;  %464 = vmatprep.subr.mxu1 %v2028_v48 }
  0x4c   :  { %394 = vmatpush1.msra.mxu0 %v2032_v49  ;;  %465 = vmatpush1.msra.mxu1 %v2034_v50  ;;  %v2914_v49 = vld [vmem:[#allocation30_spill] sm:$0xff] }
  0x4d   :  { %395 = vmatprep.subr.mxu0 %v2038_v51  ;;  %466 = vmatprep.subr.mxu1 %v2040_v52 }
  0x4e   :  { %396 = vmatpush1.msra.mxu0 %v2044_v53  ;;  %467 = vmatpush1.msra.mxu1 %v2046_v54 }
  0x4f   :  { %397 = vmatprep.subr.mxu0 %v2050_v55  ;;  %468 = vmatprep.subr.mxu1 %v2052_v56 }
  0x50   :  { %398 = vmatpush1.msra.mxu0 %v2056_v57  ;;  %469 = vmatpush1.msra.mxu1 %v2913_v58 }
  0x51   :  { %399 = vmatprep.subr.mxu0 %v2062_v59  ;;  %470 = vmatprep.subr.mxu1 %v2914_v49  ;;  %v48_v49 = vlaneseq }
  0x52   :  { %400 = vmatpush1.msra.mxu0 %v2068_v61  ;;  %471 = vmatpush1.msra.mxu1 %v2070_v62 }
  0x53   :  { %401 = vmatprep.subr.mxu0 %v2074_v63  ;;  %472 = vmatprep.subr.mxu1 %v2076_v0  ;;  %v49_v61 = vshrl.u32 %v48_v49, 7 }
  0x54   :  { %402 = vmatpush1.msra.mxu0 %v2080_v2  ;;  %435 = vmatprep.mubr.f32.mxu0 %v2912_v60 }
  0x55   :  { %473 = vmatpush1.msra.mxu1 %v2082_v1  ;;  %506 = vmatprep.mubr.f32.mxu1 %v2912_v60  ;;  %v2163_v59 = vsub.s32 0, %v49_v61  ;;  %v2165_v62 = vsub.s32 1, %v49_v61  ;;  %v2167_v63 = vsub.s32 2, %v49_v61  ;;  %v2169_v0 = vsub.s32 3, %v49_v61  ;;  %v41_v1 = vld [vmem:[%s2770_s1] sm:$0xf] }
  0x56   :  { %554 = vmatprep.subr.mxu0 %v1898_v3  ;;  %625 = vmatprep.subr.mxu1 %v1900_v4  ;;  %v72_v3 = vld [vmem:[%s2772_s3] sm:$0xf] }
  0x57   :  { %2915 = vst [vmem:[#allocation37_spill] sm:$0xff] %v2163_v59  ;;  %2916 = vst [vmem:[#allocation38_spill] sm:$0xff] %v2165_v62  ;;  %v51_v4 = vrot.slane %v41_v1, %v2163_v59  ;;  %v55_v49 = vrot.slane %v41_v1, %v2165_v62  ;;  %v59_v60 = vrot.slane %v41_v1, %v2167_v63 }
  0x58   :  { %v63_v2 = vrot.slane %v41_v1, %v2169_v0  ;;  %v77_v58 = vrot.slane %v72_v3, %v2163_v59  ;;  %v81_v61 = vrot.slane %v72_v3, %v2165_v62  ;;  %v85_v57 = vrot.slane %v72_v3, %v2167_v63 }
  0x59   :  { %v89_v56 = vrot.slane %v72_v3, %v2169_v0 }
  0xaf   :  { %v45_v55 = vpop.permute.xlu0 %44 }
  0xb0   :  { %v68_v54 = vmul.f32 %v51_v4, %v45_v55  ;;  %v69_v53 = vmul.f32 %v55_v49, %v45_v55  ;;  %v70_v52 = vmul.f32 %v59_v60, %v45_v55  ;;  %v71_v51 = vmul.f32 %v63_v2, %v45_v55 }
  0xb2   :  { %v94_v50 = vadd.f32 %v77_v58, %v68_v54  ;;  %v95_v48 = vadd.f32 %v81_v61, %v69_v53  ;;  %v96_v47 = vadd.f32 %v85_v57, %v70_v52  ;;  %v97_v46 = vadd.f32 %v89_v56, %v71_v51 }
  0xb4   :  { %98 = vst [vmem:[#allocation2] sm:$0xff] %v94_v50  ;;  %99 = vst [vmem:[#allocation2 + $0x8] sm:$0xff] %v95_v48 }
  0xb5   :  { %100 = vst [vmem:[#allocation2 + $0x10] sm:$0xff] %v96_v47  ;;  %101 = vst [vmem:[#allocation2 + $0x18] sm:$0xff] %v97_v46 }
  0xbc   :  { %v166_v1 = vld [vmem:[#allocation2] ss:$8 sm:$0xf] }
  0xbd   :  { %v171_v45 = vrot.slane %v166_v1, %v2163_v59  ;;  %v175_v44 = vrot.slane %v166_v1, %v2165_v62  ;;  %v183_v54 = vrot.slane %v166_v1, %v2169_v0  ;;  %v179_v46 = vrot.slane %v166_v1, %v2167_v63 }
  0xf3   :  { %v254_v43 = vpop.f32.mrf.mxu0 }
  0xf4   :  { %v325_v3 = vpop.f32.mrf.mxu1  ;;  %v255_v42 = vadd.f32 %v254_v43, %v171_v45 }
  0xf5   :  { %v256_v4 = vpop.f32.mrf.mxu0  ;;  %v326_v47 = vadd.f32 %v325_v3, %v179_v46  ;;  %v2922_v46 = vld [vmem:[#allocation17_spill] sm:$0xff] }
  0xf6   :  { %v330_v49 = vmul.f32 0.5, %v255_v42  ;;  %v257_v60 = vadd.f32 %v256_v4, %v175_v44  ;;  %v327_v53 = vpop.f32.mrf.mxu1 }
  0xf7   :  { %v328_v48 = vadd.f32 %v327_v53, %v183_v54  ;;  %v332_v50 = vmul.f32 0.5, %v326_v47  ;;  %v2918_v54 = vld [vmem:[#allocation13_spill] sm:$0xff]  ;;  %v2919_v53 = vld [vmem:[#allocation14_spill] sm:$0xff] }
  0xf8   :  { %1661 = vtanh.f32 %v330_v49  ;;  %v331_v51 = vmul.f32 0.5, %v257_v60  ;;  %v2917_v60 = vld [vmem:[#allocation12_spill] sm:$0xff]  ;;  %v2923_v47 = vld [vmem:[#allocation18_spill] sm:$0xff] }
  0xfa   :  { %1663 = vtanh.f32 %v331_v51  ;;  %v2920_v51 = vld [vmem:[#allocation15_spill] sm:$0xff] }
  0xfb   :  { %1665 = vtanh.f32 %v328_v48  ;;  %v2921_v48 = vld [vmem:[#allocation16_spill] sm:$0xff] }
  0xfc   :  { %1667 = vtanh.f32 %v332_v50  ;;  %v2924_v50 = vld [vmem:[#allocation19_spill] sm:$0xff] }
 0x105   :  { %v1662_v52 = vpop.eup %1661 }
 0x106   :  { %v336_v55 = vadd.f32 1.0, %v1662_v52  ;;  %v2925_v52 = vld [vmem:[#allocation20_spill] sm:$0xff] }
 0x107   :  { %v1664_v56 = vpop.eup %1663 }
 0x108   :  { %v339_v57 = vmul.f32 0.5, %v336_v55  ;;  %v337_v43 = vadd.f32 1.0, %v1664_v56  ;;  %v1666_v44 = vpop.eup %1665  ;;  %v2926_v55 = vld [vmem:[#allocation21_spill] sm:$0xff]  ;;  %v2927_v56 = vld [vmem:[#allocation22_spill] sm:$0xff] }
 0x109   :  { %v1668_v61 = vpop.eup %1667 }
 0x10a   :  { %v340_v42 = vmul.f32 0.5, %v337_v43  ;;  %v344_v2 = vmul.f32 %v1666_v44, %v339_v57  ;;  %v338_v4 = vadd.f32 1.0, %v1668_v61  ;;  %v2928_v57 = vld [vmem:[#allocation23_spill] sm:$0xff]  ;;  %v2929_v43 = vld [vmem:[#allocation24_spill] sm:$0xff]  ;;  %v2931_v44 = vld [vmem:[#allocation26_spill] sm:$0xff] }
 0x10b   :  { %v2934_v61 = vld [vmem:[#allocation29_spill] sm:$0xff] }
 0x10c   :  { %v343_v45 = vmul.f32 0.0, %v340_v42  ;;  %v341_v1 = vmul.f32 0.5, %v338_v4  ;;  %v2930_v42 = vld [vmem:[#allocation25_spill] sm:$0xff]  ;;  %v2935_v4 = vld [vmem:[#allocation30_spill] sm:$0xff] }
 0x10e   :  { %v2189_v58 = vadd.f32 %v344_v2, %v343_v45  ;;  %v2932_v45 = vld [vmem:[#allocation27_spill] sm:$0xff]  ;;  %v2933_v2 = vld [vmem:[#allocation28_spill] sm:$0xff] }
 0x110   :  { %1669 = vtanh.f32 %v2189_v58 }
 0x11d   :  { %v1670_v49 = vpop.eup %1669 }
 0x11e   :  { %v347_v3 = vmul.f32 %v1670_v49, %v341_v1  ;;  %v2936_v1 = vld [vmem:[#allocation31_spill] sm:$0xff]  ;;  %v2937_v49 = vld [vmem:[#allocation32_spill] sm:$0xff] }
 0x120   :  { %436 = vmatmul.mubr.f32.vlgmr.msra.gmra.mxu0 %v347_v3  ;;  %507 = vmatmul.mubr.f32.vlgmr.msra.gmra.mxu1 %v347_v3  ;;  %v2938_v3 = vld [vmem:[#allocation33_spill] sm:$0xff] }
 0x121   :  { %555 = vmatpush1.msra.mxu0 %v1902_v5  ;;  %626 = vmatpush1.msra.mxu1 %v1906_v6 }
 0x122   :  { %556 = vmatprep.subr.mxu0 %v1908_v7  ;;  %627 = vmatprep.subr.mxu1 %v1910_v8 }
 0x123   :  { %557 = vmatpush1.msra.mxu0 %v1914_v9  ;;  %628 = vmatpush1.msra.mxu1 %v1916_v10 }
 0x124   :  { %558 = vmatprep.subr.mxu0 %v1918_v11  ;;  %629 = vmatprep.subr.mxu1 %v1922_v12 }
 0x125   :  { %559 = vmatpush1.msra.mxu0 %v1924_v13  ;;  %630 = vmatpush1.msra.mxu1 %v1926_v14 }
 0x126   :  { %560 = vmatprep.subr.mxu0 %v1930_v15  ;;  %631 = vmatprep.subr.mxu1 %v1932_v16 }
 0x127   :  { %561 = vmatpush1.msra.mxu0 %v1936_v17  ;;  %632 = vmatpush1.msra.mxu1 %v1938_v18 }
 0x128   :  { %562 = vmatprep.subr.mxu0 %v1942_v19  ;;  %633 = vmatprep.subr.mxu1 %v1944_v20 }
 0x129   :  { %563 = vmatpush1.msra.mxu0 %v1948_v21  ;;  %634 = vmatpush1.msra.mxu1 %v1950_v22 }
 0x12a   :  { %564 = vmatprep.subr.mxu0 %v1954_v23  ;;  %635 = vmatprep.subr.mxu1 %v1956_v24 }
 0x12b   :  { %565 = vmatpush1.msra.mxu0 %v1960_v25  ;;  %636 = vmatpush1.msra.mxu1 %v1962_v26 }
 0x12c   :  { %566 = vmatprep.subr.mxu0 %v1966_v27  ;;  %637 = vmatprep.subr.mxu1 %v1968_v28 }
 0x12d   :  { %567 = vmatpush1.msra.mxu0 %v1972_v29  ;;  %638 = vmatpush1.msra.mxu1 %v1974_v30 }
 0x12e   :  { %568 = vmatprep.subr.mxu0 %v1978_v31  ;;  %639 = vmatprep.subr.mxu1 %v1980_v32 }
 0x12f   :  { %569 = vmatpush1.msra.mxu0 %v1984_v33  ;;  %640 = vmatpush1.msra.mxu1 %v1986_v34 }
 0x130   :  { %570 = vmatprep.subr.mxu0 %v1990_v35  ;;  %641 = vmatprep.subr.mxu1 %v1992_v36 }
 0x131   :  { %571 = vmatpush1.msra.mxu0 %v1996_v37  ;;  %642 = vmatpush1.msra.mxu1 %v1998_v38 }
 0x132   :  { %572 = vmatprep.subr.mxu0 %v2002_v39  ;;  %643 = vmatprep.subr.mxu1 %v2004_v40 }
 0x133   :  { %573 = vmatpush1.msra.mxu0 %v2008_v41  ;;  %644 = vmatpush1.msra.mxu1 %v2917_v60 }
 0x134   :  { %574 = vmatprep.subr.mxu0 %v2918_v54  ;;  %645 = vmatprep.subr.mxu1 %v2919_v53 }
 0x135   :  { %575 = vmatpush1.msra.mxu0 %v2920_v51  ;;  %646 = vmatpush1.msra.mxu1 %v2921_v48 }
 0x136   :  { %576 = vmatprep.subr.mxu0 %v2922_v46  ;;  %647 = vmatprep.subr.mxu1 %v2923_v47 }
 0x137   :  { %577 = vmatpush1.msra.mxu0 %v2924_v50  ;;  %648 = vmatpush1.msra.mxu1 %v2925_v52 }
 0x138   :  { %578 = vmatprep.subr.mxu0 %v2926_v55  ;;  %649 = vmatprep.subr.mxu1 %v2927_v56 }
 0x139   :  { %579 = vmatpush1.msra.mxu0 %v2928_v57  ;;  %650 = vmatpush1.msra.mxu1 %v2929_v43  ;;  %v2939_v57 = vld [vmem:[#allocation34_spill] sm:$0xff]  ;;  %v2940_v43 = vld [vmem:[#allocation35_spill] sm:$0xff] }
 0x13a   :  { %580 = vmatprep.subr.mxu0 %v2930_v42  ;;  %651 = vmatprep.subr.mxu1 %v2931_v44  ;;  %v2941_v42 = vmov 0.0   ;;  %v2942_v44 = vld [vmem:[#allocation36_spill] sm:$0xff] }
 0x13b   :  { %581 = vmatpush1.msra.mxu0 %v2932_v45  ;;  %652 = vmatpush1.msra.mxu1 %v2933_v2  ;;  %v2943_v2 = vld [vmem:[#allocation10_spill] sm:$0xff] }
 0x13c   :  { %582 = vmatprep.subr.mxu0 %v2934_v61  ;;  %653 = vmatprep.subr.mxu1 %v2935_v4  ;;  %v2944_v61 = vld [vmem:[#allocation11_spill] sm:$0xff] }
 0x13d   :  { %583 = vmatpush1.msra.mxu0 %v2936_v1  ;;  %654 = vmatpush1.msra.mxu1 %v2937_v49  ;;  %v349_v4 = vld [vmem:[#allocation2 + $0x1] ss:$8 sm:$0xf] }
 0x13e   :  { %584 = vmatprep.subr.mxu0 %v2938_v3  ;;  %655 = vmatprep.subr.mxu1 %v2939_v57  ;;  %v354_v1 = vrot.slane %v349_v4, %v2163_v59  ;;  %v358_v57 = vrot.slane %v349_v4, %v2165_v62 }
 0x13f   :  { %585 = vmatpush1.msra.mxu0 %v2940_v43  ;;  %618 = vmatprep.mubr.f32.mxu0 %v2941_v42 }
 0x140   :  { %656 = vmatpush1.msra.mxu1 %v2942_v44  ;;  %689 = vmatprep.mubr.f32.mxu1 %v2941_v42  ;;  %v366_v42 = vrot.slane %v349_v4, %v2169_v0 }
 0x141   :  { %737 = vmatprep.subr.mxu0 %v2943_v2  ;;  %808 = vmatprep.subr.mxu1 %v2944_v61  ;;  %v362_v61 = vrot.slane %v349_v4, %v2167_v63  ;;  %v2952_v4 = vld [vmem:[#allocation24_spill] sm:$0xff] }
 0x1e0   :  { %v437_v49 = vpop.f32.mrf.mxu0  ;;  %v508_v45 = vpop.f32.mrf.mxu1 }
 0x1e1   :  { %v438_v3 = vadd.f32 %v437_v49, %v354_v1  ;;  %v509_v50 = vadd.f32 %v508_v45, %v362_v61  ;;  %v2951_v61 = vld [vmem:[#allocation23_spill] sm:$0xff] }
 0x1e2   :  { %v439_v56 = vpop.f32.mrf.mxu0  ;;  %v510_v52 = vpop.f32.mrf.mxu1 }
 0x1e3   :  { %v513_v43 = vmul.f32 0.5, %v438_v3  ;;  %v440_v55 = vadd.f32 %v439_v56, %v358_v57  ;;  %v511_v2 = vadd.f32 %v510_v52, %v366_v42  ;;  %v515_v59 = vmul.f32 0.5, %v509_v50 }
 0x1e5   :  { %1671 = vtanh.f32 %v513_v43  ;;  %v514_v44 = vmul.f32 0.5, %v440_v55 }
 0x1e7   :  { %1673 = vtanh.f32 %v514_v44 }
 0x1e8   :  { %1675 = vtanh.f32 %v511_v2  ;;  %v2950_v2 = vld [vmem:[#allocation22_spill] sm:$0xff] }
 0x1e9   :  { %1677 = vtanh.f32 %v515_v59  ;;  %v2945_v59 = vld [vmem:[#allocation17_spill] sm:$0xff] }
 0x1f2   :  { %v1672_v47 = vpop.eup %1671 }
 0x1f3   :  { %v519_v46 = vadd.f32 1.0, %v1672_v47  ;;  %v2949_v47 = vld [vmem:[#allocation21_spill] sm:$0xff] }
 0x1f4   :  { %v1674_v1 = vpop.eup %1673 }
 0x1f5   :  { %v522_v49 = vmul.f32 0.5, %v519_v46  ;;  %v520_v62 = vadd.f32 1.0, %v1674_v1  ;;  %v1676_v56 = vpop.eup %1675  ;;  %v2948_v46 = vld [vmem:[#allocation20_spill] sm:$0xff]  ;;  %v2953_v1 = vld [vmem:[#allocation25_spill] sm:$0xff] }
 0x1f6   :  { %v1678_v52 = vpop.eup %1677 }
 0x1f7   :  { %v523_v3 = vmul.f32 0.5, %v520_v62  ;;  %v527_v55 = vmul.f32 %v1676_v56, %v522_v49  ;;  %v521_v42 = vadd.f32 1.0, %v1678_v52  ;;  %v2946_v62 = vld [vmem:[#allocation18_spill] sm:$0xff]  ;;  %v2956_v56 = vld [vmem:[#allocation28_spill] sm:$0xff]  ;;  %v2959_v52 = vld [vmem:[#allocation31_spill] sm:$0xff] }
 0x1f8   :  { %v2954_v49 = vld [vmem:[#allocation26_spill] sm:$0xff] }
 0x1f9   :  { %v526_v57 = vmul.f32 %v523_v3, %v2189_v58  ;;  %v524_v44 = vmul.f32 0.5, %v521_v42  ;;  %v2947_v58 = vld [vmem:[#allocation19_spill] sm:$0xff]  ;;  %v2960_v42 = vld [vmem:[#allocation32_spill] sm:$0xff] }
 0x1fa   :  { %v2955_v3 = vld [vmem:[#allocation27_spill] sm:$0xff] }
 0x1fb   :  { %v2263_v43 = vadd.f32 %v527_v55, %v526_v57  ;;  %v2957_v57 = vld [vmem:[#allocation29_spill] sm:$0xff]  ;;  %v2958_v55 = vld [vmem:[#allocation30_spill] sm:$0xff] }
 0x1fd   :  { %1679 = vtanh.f32 %v2263_v43 }
 0x20a   :  { %v1680_v45 = vpop.eup %1679 }
 0x20b   :  { %v530_v50 = vmul.f32 %v1680_v45, %v524_v44  ;;  %v2961_v44 = vld [vmem:[#allocation33_spill] sm:$0xff]  ;;  %v2962_v45 = vld [vmem:[#allocation34_spill] sm:$0xff] }
 0x20d   :  { %619 = vmatmul.mubr.f32.vlgmr.msra.gmra.mxu0 %v530_v50  ;;  %690 = vmatmul.mubr.f32.vlgmr.msra.gmra.mxu1 %v530_v50  ;;  %v2963_v50 = vld [vmem:[#allocation35_spill] sm:$0xff] }
 0x20e   :  { %738 = vmatpush1.msra.mxu0 %v1902_v5  ;;  %809 = vmatpush1.msra.mxu1 %v1906_v6 }
 0x20f   :  { %739 = vmatprep.subr.mxu0 %v1908_v7  ;;  %810 = vmatprep.subr.mxu1 %v1910_v8 }
 0x210   :  { %740 = vmatpush1.msra.mxu0 %v1914_v9  ;;  %811 = vmatpush1.msra.mxu1 %v1916_v10 }
 0x211   :  { %741 = vmatprep.subr.mxu0 %v1918_v11  ;;  %812 = vmatprep.subr.mxu1 %v1922_v12 }
 0x212   :  { %742 = vmatpush1.msra.mxu0 %v1924_v13  ;;  %813 = vmatpush1.msra.mxu1 %v1926_v14 }
 0x213   :  { %743 = vmatprep.subr.mxu0 %v1930_v15  ;;  %814 = vmatprep.subr.mxu1 %v1932_v16 }
 0x214   :  { %744 = vmatpush1.msra.mxu0 %v1936_v17  ;;  %815 = vmatpush1.msra.mxu1 %v1938_v18 }
 0x215   :  { %745 = vmatprep.subr.mxu0 %v1942_v19  ;;  %816 = vmatprep.subr.mxu1 %v1944_v20 }
 0x216   :  { %746 = vmatpush1.msra.mxu0 %v1948_v21  ;;  %817 = vmatpush1.msra.mxu1 %v1950_v22 }
 0x217   :  { %747 = vmatprep.subr.mxu0 %v1954_v23  ;;  %818 = vmatprep.subr.mxu1 %v1956_v24 }
 0x218   :  { %748 = vmatpush1.msra.mxu0 %v1960_v25  ;;  %819 = vmatpush1.msra.mxu1 %v1962_v26 }
 0x219   :  { %749 = vmatprep.subr.mxu0 %v1966_v27  ;;  %820 = vmatprep.subr.mxu1 %v1968_v28 }
 0x21a   :  { %750 = vmatpush1.msra.mxu0 %v1972_v29  ;;  %821 = vmatpush1.msra.mxu1 %v1974_v30 }
 0x21b   :  { %751 = vmatprep.subr.mxu0 %v1978_v31  ;;  %822 = vmatprep.subr.mxu1 %v1980_v32 }
 0x21c   :  { %752 = vmatpush1.msra.mxu0 %v1984_v33  ;;  %823 = vmatpush1.msra.mxu1 %v1986_v34 }
 0x21d   :  { %753 = vmatprep.subr.mxu0 %v1990_v35  ;;  %824 = vmatprep.subr.mxu1 %v1992_v36 }
 0x21e   :  { %754 = vmatpush1.msra.mxu0 %v1996_v37  ;;  %825 = vmatpush1.msra.mxu1 %v1998_v38 }
 0x21f   :  { %755 = vmatprep.subr.mxu0 %v2002_v39  ;;  %826 = vmatprep.subr.mxu1 %v2004_v40 }
 0x220   :  { %756 = vmatpush1.msra.mxu0 %v2008_v41  ;;  %827 = vmatpush1.msra.mxu1 %v2917_v60 }
 0x221   :  { %757 = vmatprep.subr.mxu0 %v2918_v54  ;;  %828 = vmatprep.subr.mxu1 %v2919_v53 }
 0x222   :  { %758 = vmatpush1.msra.mxu0 %v2920_v51  ;;  %829 = vmatpush1.msra.mxu1 %v2921_v48 }
 0x223   :  { %759 = vmatprep.subr.mxu0 %v2945_v59  ;;  %830 = vmatprep.subr.mxu1 %v2946_v62 }
 0x224   :  { %760 = vmatpush1.msra.mxu0 %v2947_v58  ;;  %831 = vmatpush1.msra.mxu1 %v2948_v46 }
 0x225   :  { %761 = vmatprep.subr.mxu0 %v2949_v47  ;;  %832 = vmatprep.subr.mxu1 %v2950_v2 }
 0x226   :  { %762 = vmatpush1.msra.mxu0 %v2951_v61  ;;  %833 = vmatpush1.msra.mxu1 %v2952_v4  ;;  %v2969_v61 = vld [vmem:[#allocation38_spill] sm:$0xff] }
 0x227   :  { %763 = vmatprep.subr.mxu0 %v2953_v1  ;;  %834 = vmatprep.subr.mxu1 %v2954_v49  ;;  %v2964_v1 = vmov 0.0   ;;  %v2965_v49 = vld [vmem:[#allocation36_spill] sm:$0xff] }
 0x228   :  { %764 = vmatpush1.msra.mxu0 %v2955_v3  ;;  %835 = vmatpush1.msra.mxu1 %v2956_v56  ;;  %v2966_v56 = vld [vmem:[#allocation10_spill] sm:$0xff] }
 0x229   :  { %765 = vmatprep.subr.mxu0 %v2957_v57  ;;  %836 = vmatprep.subr.mxu1 %v2958_v55  ;;  %v2967_v57 = vld [vmem:[#allocation11_spill] sm:$0xff] }
 0x22a   :  { %766 = vmatpush1.msra.mxu0 %v2959_v52  ;;  %837 = vmatpush1.msra.mxu1 %v2960_v42  ;;  %v532_v55 = vld [vmem:[#allocation2 + $0x2] ss:$8 sm:$0xf] }
 0x22b   :  { %767 = vmatprep.subr.mxu0 %v2961_v44  ;;  %838 = vmatprep.subr.mxu1 %v2962_v45  ;;  %v2968_v52 = vld [vmem:[#allocation37_spill] sm:$0xff]  ;;  %v541_v45 = vrot.slane %v532_v55, %v2969_v61 }
 0x22c   :  { %768 = vmatpush1.msra.mxu0 %v2963_v50  ;;  %801 = vmatprep.mubr.f32.mxu0 %v2964_v1  ;;  %v537_v3 = vrot.slane %v532_v55, %v2968_v52 }
 0x22d   :  { %839 = vmatpush1.msra.mxu1 %v2965_v49  ;;  %872 = vmatprep.mubr.f32.mxu1 %v2964_v1  ;;  %v549_v1 = vrot.slane %v532_v55, %v2169_v0 }
 0x22e   :  { %920 = vmatprep.subr.mxu0 %v2966_v56  ;;  %991 = vmatprep.subr.mxu1 %v2967_v57  ;;  %v545_v57 = vrot.slane %v532_v55, %v2167_v63 }
 0x2cd   :  { %v620_v42 = vpop.f32.mrf.mxu0  ;;  %v691_v4 = vpop.f32.mrf.mxu1 }
 0x2ce   :  { %v621_v44 = vadd.f32 %v620_v42, %v537_v3  ;;  %v692_v58 = vadd.f32 %v691_v4, %v545_v57 }
 0x2cf   :  { %v622_v2 = vpop.f32.mrf.mxu0  ;;  %v693_v46 = vpop.f32.mrf.mxu1 }
 0x2d0   :  { %v696_v50 = vmul.f32 0.5, %v621_v44  ;;  %v623_v47 = vadd.f32 %v622_v2, %v541_v45  ;;  %v694_v56 = vadd.f32 %v693_v46, %v549_v1  ;;  %v698_v52 = vmul.f32 0.5, %v692_v58 }
 0x2d2   :  { %1681 = vtanh.f32 %v696_v50  ;;  %v697_v49 = vmul.f32 0.5, %v623_v47 }
 0x2d4   :  { %1683 = vtanh.f32 %v697_v49 }
 0x2d5   :  { %1685 = vtanh.f32 %v694_v56 }
 0x2d6   :  { %1687 = vtanh.f32 %v698_v52 }
 0x2df   :  { %v1682_v62 = vpop.eup %1681 }
 0x2e0   :  { %v702_v59 = vadd.f32 1.0, %v1682_v62 }
 0x2e1   :  { %v1684_v3 = vpop.eup %1683 }
 0x2e2   :  { %v705_v42 = vmul.f32 0.5, %v702_v59  ;;  %v703_v61 = vadd.f32 1.0, %v1684_v3  ;;  %v1686_v2 = vpop.eup %1685 }
 0x2e3   :  { %v1688_v46 = vpop.eup %1687 }
 0x2e4   :  { %v706_v44 = vmul.f32 0.5, %v703_v61  ;;  %v710_v47 = vmul.f32 %v1686_v2, %v705_v42  ;;  %v704_v1 = vadd.f32 1.0, %v1688_v46  ;;  %v2418_v46 = vld [vmem:[#allocation4 + $0x1e0] sm:$0xff] }
 0x2e6   :  { %v709_v45 = vmul.f32 %v706_v44, %v2263_v43  ;;  %v707_v49 = vmul.f32 0.5, %v704_v1  ;;  %v2421_v1 = vld [vmem:[#allocation4 + $0x1f0] sm:$0xff] }
 0x2e8   :  { %v2337_v50 = vadd.f32 %v710_v47, %v709_v45 }
 0x2ea   :  { %1689 = vtanh.f32 %v2337_v50 }
 0x2f7   :  { %v1690_v4 = vpop.eup %1689 }
 0x2f8   :  { %v713_v58 = vmul.f32 %v1690_v4, %v707_v49  ;;  %v2427_v49 = vld [vmem:[#allocation4 + $0x1d8] sm:$0xff]  ;;  %v2430_v4 = vld [vmem:[#allocation4 + $0x1c0] sm:$0xff] }
 0x2fa   :  { %802 = vmatmul.mubr.f32.vlgmr.msra.gmra.mxu0 %v713_v58  ;;  %873 = vmatmul.mubr.f32.vlgmr.msra.gmra.mxu1 %v713_v58  ;;  %v2433_v58 = vld [vmem:[#allocation4 + $0x1d0] sm:$0xff] }
 0x2fb   :  { %921 = vmatpush1.msra.mxu0 %v1902_v5  ;;  %992 = vmatpush1.msra.mxu1 %v1906_v6  ;;  %v2970_v5 = vld [vmem:[#allocation17_spill] sm:$0xff]  ;;  %v2971_v6 = vld [vmem:[#allocation18_spill] sm:$0xff] }
 0x2fc   :  { %922 = vmatprep.subr.mxu0 %v1908_v7  ;;  %993 = vmatprep.subr.mxu1 %v1910_v8  ;;  %v2972_v7 = vld [vmem:[#allocation19_spill] sm:$0xff]  ;;  %v2973_v8 = vld [vmem:[#allocation20_spill] sm:$0xff] }
 0x2fd   :  { %923 = vmatpush1.msra.mxu0 %v1914_v9  ;;  %994 = vmatpush1.msra.mxu1 %v1916_v10  ;;  %v2974_v9 = vld [vmem:[#allocation21_spill] sm:$0xff]  ;;  %v2975_v10 = vld [vmem:[#allocation22_spill] sm:$0xff] }
 0x2fe   :  { %924 = vmatprep.subr.mxu0 %v1918_v11  ;;  %995 = vmatprep.subr.mxu1 %v1922_v12  ;;  %v2976_v11 = vld [vmem:[#allocation23_spill] sm:$0xff]  ;;  %v2977_v12 = vld [vmem:[#allocation24_spill] sm:$0xff] }
 0x2ff   :  { %925 = vmatpush1.msra.mxu0 %v1924_v13  ;;  %996 = vmatpush1.msra.mxu1 %v1926_v14  ;;  %v2978_v13 = vld [vmem:[#allocation25_spill] sm:$0xff]  ;;  %v2979_v14 = vld [vmem:[#allocation26_spill] sm:$0xff] }
 0x300   :  { %926 = vmatprep.subr.mxu0 %v1930_v15  ;;  %997 = vmatprep.subr.mxu1 %v1932_v16  ;;  %v2980_v15 = vld [vmem:[#allocation27_spill] sm:$0xff]  ;;  %v2981_v16 = vld [vmem:[#allocation28_spill] sm:$0xff] }
 0x301   :  { %927 = vmatpush1.msra.mxu0 %v1936_v17  ;;  %998 = vmatpush1.msra.mxu1 %v1938_v18  ;;  %v2982_v17 = vld [vmem:[#allocation29_spill] sm:$0xff]  ;;  %v2983_v18 = vld [vmem:[#allocation30_spill] sm:$0xff] }
 0x302   :  { %928 = vmatprep.subr.mxu0 %v1942_v19  ;;  %999 = vmatprep.subr.mxu1 %v1944_v20  ;;  %v2984_v19 = vld [vmem:[#allocation31_spill] sm:$0xff]  ;;  %v2985_v20 = vld [vmem:[#allocation32_spill] sm:$0xff] }
 0x303   :  { %929 = vmatpush1.msra.mxu0 %v1948_v21  ;;  %1000 = vmatpush1.msra.mxu1 %v1950_v22  ;;  %v2986_v21 = vld [vmem:[#allocation33_spill] sm:$0xff]  ;;  %v2987_v22 = vld [vmem:[#allocation34_spill] sm:$0xff] }
 0x304   :  { %930 = vmatprep.subr.mxu0 %v1954_v23  ;;  %1001 = vmatprep.subr.mxu1 %v1956_v24  ;;  %v2988_v23 = vld [vmem:[#allocation35_spill] sm:$0xff]  ;;  %v2989_v24 = vmov 0.0  }
 0x305   :  { %931 = vmatpush1.msra.mxu0 %v1960_v25  ;;  %1002 = vmatpush1.msra.mxu1 %v1962_v26  ;;  %v2990_v25 = vld [vmem:[#allocation36_spill] sm:$0xff]  ;;  %v2404_v26 = vld [vmem:[#allocation4 + $0x1e8] sm:$0xff] }
 0x306   :  { %932 = vmatprep.subr.mxu0 %v1966_v27  ;;  %1003 = vmatprep.subr.mxu1 %v1968_v28  ;;  %2991 = vst [vmem:[#allocation12_spill] sm:$0xff] %v2404_v26  ;;  %v2407_v27 = vld [vmem:[#allocation4 + $0x1f8] sm:$0xff] }
 0x307   :  { %933 = vmatpush1.msra.mxu0 %v1972_v29  ;;  %1004 = vmatpush1.msra.mxu1 %v1974_v30  ;;  %2992 = vst [vmem:[#allocation13_spill] sm:$0xff] %v2407_v27  ;;  %v715_v28 = vld [vmem:[#allocation2 + $0x3] ss:$8 sm:$0xf] }
 0x308   :  { %934 = vmatprep.subr.mxu0 %v1978_v31  ;;  %1005 = vmatprep.subr.mxu1 %v1980_v32  ;;  %v2993_v29 = vld [vmem:[#allocation37_spill] sm:$0xff] }
 0x309   :  { %935 = vmatpush1.msra.mxu0 %v1984_v33  ;;  %1006 = vmatpush1.msra.mxu1 %v1986_v34  ;;  %v720_v30 = vrot.slane %v715_v28, %v2993_v29  ;;  %v2994_v34 = vld [vmem:[#allocation38_spill] sm:$0xff] }
 0x30a   :  { %936 = vmatprep.subr.mxu0 %v1990_v35  ;;  %1007 = vmatprep.subr.mxu1 %v1992_v36  ;;  %v724_v35 = vrot.slane %v715_v28, %v2994_v34 }
 0x30b   :  { %937 = vmatpush1.msra.mxu0 %v1996_v37  ;;  %1008 = vmatpush1.msra.mxu1 %v1998_v38 }
 0x30c   :  { %938 = vmatprep.subr.mxu0 %v2002_v39  ;;  %1009 = vmatprep.subr.mxu1 %v2004_v40 }
 0x30d   :  { %939 = vmatpush1.msra.mxu0 %v2008_v41  ;;  %1010 = vmatpush1.msra.mxu1 %v2917_v60  ;;  %v732_v41 = vrot.slane %v715_v28, %v2169_v0 }
 0x30e   :  { %940 = vmatprep.subr.mxu0 %v2918_v54  ;;  %1011 = vmatprep.subr.mxu1 %v2919_v53  ;;  %v728_v54 = vrot.slane %v715_v28, %v2167_v63  ;;  %v2496_v28 = vld [vmem:[#allocation4 + $0x108] sm:$0xff] }
 0x30f   :  { %941 = vmatpush1.msra.mxu0 %v2920_v51  ;;  %1012 = vmatpush1.msra.mxu1 %v2921_v48 }
 0x310   :  { %942 = vmatprep.subr.mxu0 %v2970_v5  ;;  %1013 = vmatprep.subr.mxu1 %v2971_v6  ;;  %v2436_v5 = vld [vmem:[#allocation4 + $0x1a8] sm:$0xff]  ;;  %v2439_v6 = vld [vmem:[#allocation4 + $0x1b8] sm:$0xff] }
 0x311   :  { %943 = vmatpush1.msra.mxu0 %v2972_v7  ;;  %1014 = vmatpush1.msra.mxu1 %v2973_v8  ;;  %v2442_v7 = vld [vmem:[#allocation4 + $0x1a0] sm:$0xff]  ;;  %v2445_v8 = vld [vmem:[#allocation4 + $0x1b0] sm:$0xff] }
 0x312   :  { %944 = vmatprep.subr.mxu0 %v2974_v9  ;;  %1015 = vmatprep.subr.mxu1 %v2975_v10  ;;  %v2448_v9 = vld [vmem:[#allocation4 + $0x188] sm:$0xff]  ;;  %v2451_v10 = vld [vmem:[#allocation4 + $0x198] sm:$0xff] }
 0x313   :  { %945 = vmatpush1.msra.mxu0 %v2976_v11  ;;  %1016 = vmatpush1.msra.mxu1 %v2977_v12  ;;  %v2454_v11 = vld [vmem:[#allocation4 + $0x180] sm:$0xff]  ;;  %v2457_v12 = vld [vmem:[#allocation4 + $0x190] sm:$0xff] }
 0x314   :  { %946 = vmatprep.subr.mxu0 %v2978_v13  ;;  %1017 = vmatprep.subr.mxu1 %v2979_v14  ;;  %v2460_v13 = vld [vmem:[#allocation4 + $0x168] sm:$0xff]  ;;  %v2463_v14 = vld [vmem:[#allocation4 + $0x178] sm:$0xff] }
 0x315   :  { %947 = vmatpush1.msra.mxu0 %v2980_v15  ;;  %1018 = vmatpush1.msra.mxu1 %v2981_v16  ;;  %v2466_v15 = vld [vmem:[#allocation4 + $0x160] sm:$0xff]  ;;  %v2469_v16 = vld [vmem:[#allocation4 + $0x170] sm:$0xff] }
 0x316   :  { %948 = vmatprep.subr.mxu0 %v2982_v17  ;;  %1019 = vmatprep.subr.mxu1 %v2983_v18  ;;  %v2472_v17 = vld [vmem:[#allocation4 + $0x148] sm:$0xff]  ;;  %v2475_v18 = vld [vmem:[#allocation4 + $0x158] sm:$0xff] }
 0x317   :  { %949 = vmatpush1.msra.mxu0 %v2984_v19  ;;  %1020 = vmatpush1.msra.mxu1 %v2985_v20  ;;  %v2478_v19 = vld [vmem:[#allocation4 + $0x140] sm:$0xff]  ;;  %v2481_v20 = vld [vmem:[#allocation4 + $0x150] sm:$0xff] }
 0x318   :  { %950 = vmatprep.subr.mxu0 %v2986_v21  ;;  %1021 = vmatprep.subr.mxu1 %v2987_v22  ;;  %v2484_v21 = vld [vmem:[#allocation4 + $0x128] sm:$0xff]  ;;  %v2487_v22 = vld [vmem:[#allocation4 + $0x138] sm:$0xff] }
 0x319   :  { %951 = vmatpush1.msra.mxu0 %v2988_v23  ;;  %984 = vmatprep.mubr.f32.mxu0 %v2989_v24  ;;  %v2490_v23 = vld [vmem:[#allocation4 + $0x120] sm:$0xff] }
 0x31a   :  { %1022 = vmatpush1.msra.mxu1 %v2990_v25  ;;  %1055 = vmatprep.mubr.f32.mxu1 %v2989_v24  ;;  %v2493_v25 = vld [vmem:[#allocation4 + $0x130] sm:$0xff] }
 0x31b   :  { %1103 = vmatprep.subr.mxu0 %v2404_v26  ;;  %1174 = vmatprep.subr.mxu1 %v2407_v27 }
 0x3ba   :  { %v803_v31 = vpop.f32.mrf.mxu0  ;;  %v874_v32 = vpop.f32.mrf.mxu1 }
 0x3bb   :  { %v804_v33 = vadd.f32 %v803_v31, %v720_v30  ;;  %v875_v53 = vadd.f32 %v874_v32, %v728_v54  ;;  %v2499_v30 = vld [vmem:[#allocation4 + $0x118] sm:$0xff]  ;;  %v2502_v31 = vld [vmem:[#allocation4 + $0x100] sm:$0xff]  ;;  %v2505_v32 = vld [vmem:[#allocation4 + $0x110] sm:$0xff] }
 0x3bc   :  { %v805_v36 = vpop.f32.mrf.mxu0  ;;  %v876_v39 = vpop.f32.mrf.mxu1  ;;  %v2535_v54 = vld [vmem:[#allocation4 + $0xb8] sm:$0xff] }
 0x3bd   :  { %v879_v37 = vmul.f32 0.5, %v804_v33  ;;  %v806_v38 = vadd.f32 %v805_v36, %v724_v35  ;;  %v877_v60 = vadd.f32 %v876_v39, %v732_v41  ;;  %v881_v51 = vmul.f32 0.5, %v875_v53  ;;  %v2508_v33 = vld [vmem:[#allocation4 + $0xe8] sm:$0xff]  ;;  %v2511_v35 = vld [vmem:[#allocation4 + $0xf8] sm:$0xff]  ;;  %v2514_v36 = vld [vmem:[#allocation4 + $0xe0] sm:$0xff] }
 0x3be   :  { %v2523_v39 = vld [vmem:[#allocation4 + $0xd8] sm:$0xff]  ;;  %v2529_v41 = vld [vmem:[#allocation4 + $0xd0] sm:$0xff]  ;;  %v2538_v53 = vld [vmem:[#allocation4 + $0xa0] sm:$0xff] }
 0x3bf   :  { %1691 = vtanh.f32 %v879_v37  ;;  %v880_v40 = vmul.f32 0.5, %v806_v38  ;;  %v2517_v37 = vld [vmem:[#allocation4 + $0xf0] sm:$0xff]  ;;  %v2520_v38 = vld [vmem:[#allocation4 + $0xc8] sm:$0xff] }
 0x3c1   :  { %1693 = vtanh.f32 %v880_v40  ;;  %v2526_v40 = vld [vmem:[#allocation4 + $0xc0] sm:$0xff] }
 0x3c2   :  { %1695 = vtanh.f32 %v877_v60  ;;  %v2532_v60 = vld [vmem:[#allocation4 + $0xa8] sm:$0xff] }
 0x3c3   :  { %1697 = vtanh.f32 %v881_v51  ;;  %v2541_v51 = vld [vmem:[#allocation4 + $0xb0] sm:$0xff] }
 0x3cc   :  { %v1692_v48 = vpop.eup %1691 }
 0x3cd   :  { %v885_v43 = vadd.f32 1.0, %v1692_v48  ;;  %v2544_v48 = vld [vmem:[#allocation4 + $0x88] sm:$0xff] }
 0x3ce   :  { %v1694_v59 = vpop.eup %1693  ;;  %2995 = vst [vmem:[#allocation14_spill] sm:$0xff] %v2544_v48 }
 0x3cf   :  { %v888_v62 = vmul.f32 0.5, %v885_v43  ;;  %v886_v61 = vadd.f32 1.0, %v1694_v59  ;;  %v1696_v52 = vpop.eup %1695  ;;  %v2547_v43 = vld [vmem:[#allocation4 + $0x98] sm:$0xff]  ;;  %v2550_v59 = vld [vmem:[#allocation4 + $0x80] sm:$0xff] }
 0x3d0   :  { %v1698_v42 = vpop.eup %1697  ;;  %2996 = vst [vmem:[#allocation15_spill] sm:$0xff] %v2547_v43  ;;  %2997 = vst [vmem:[#allocation16_spill] sm:$0xff] %v2550_v59 }
 0x3d1   :  { %v889_v55 = vmul.f32 0.5, %v886_v61  ;;  %v893_v57 = vmul.f32 %v1696_v52, %v888_v62  ;;  %v887_v44 = vadd.f32 1.0, %v1698_v42  ;;  %v2553_v62 = vld [vmem:[#allocation4 + $0x90] sm:$0xff]  ;;  %v2556_v61 = vld [vmem:[#allocation4 + $0x68] sm:$0xff]  ;;  %v2562_v52 = vld [vmem:[#allocation4 + $0x60] sm:$0xff] }
 0x3d2   :  { %2998 = vst [vmem:[#allocation10_spill] sm:$0xff] %v2553_v62  ;;  %2999 = vst [vmem:[#allocation11_spill] sm:$0xff] %v2556_v61  ;;  %v2571_v42 = vld [vmem:[#allocation4 + $0x58] sm:$0xff] }
 0x3d3   :  { %v892_v56 = vmul.f32 %v889_v55, %v2337_v50  ;;  %v890_v2 = vmul.f32 0.5, %v887_v44  ;;  %v2424_v50 = vld [vmem:[#allocation4 + $0x1c8] sm:$0xff]  ;;  %v2559_v55 = vld [vmem:[#allocation4 + $0x78] sm:$0xff]  ;;  %3001 = vst [vmem:[#allocation18_spill] sm:$0xff] %v2562_v52  ;;  %3004 = vst [vmem:[#allocation21_spill] sm:$0xff] %v2571_v42 }
 0x3d4   :  { %3000 = vst [vmem:[#allocation17_spill] sm:$0xff] %v2559_v55  ;;  %v2574_v44 = vld [vmem:[#allocation4 + $0x40] sm:$0xff] }
 0x3d5   :  { %v2415_v3 = vadd.f32 %v893_v57, %v892_v56  ;;  %v2565_v56 = vld [vmem:[#allocation4 + $0x70] sm:$0xff]  ;;  %v2568_v57 = vld [vmem:[#allocation4 + $0x48] sm:$0xff]  ;;  %3005 = vst [vmem:[#allocation22_spill] sm:$0xff] %v2574_v44 }
 0x3d6   :  { %3002 = vst [vmem:[#allocation19_spill] sm:$0xff] %v2565_v56  ;;  %3003 = vst [vmem:[#allocation20_spill] sm:$0xff] %v2568_v57 }
 0x3d7   :  { %1699 = vtanh.f32 %v2415_v3 }
 0x3e4   :  { %v1700_v45 = vpop.eup %1699 }
 0x3e5   :  { %v896_v47 = vmul.f32 %v1700_v45, %v890_v2  ;;  %v2577_v2 = vld [vmem:[#allocation4 + $0x50] sm:$0xff]  ;;  %v2580_v45 = vld [vmem:[#allocation4 + $0x28] sm:$0xff] }
 0x3e6   :  { %3006 = vst [vmem:[#allocation23_spill] sm:$0xff] %v2577_v2  ;;  %3007 = vst [vmem:[#allocation24_spill] sm:$0xff] %v2580_v45 }
 0x3e7   :  { %985 = vmatmul.mubr.f32.vlgmr.msra.gmra.mxu0 %v896_v47  ;;  %1056 = vmatmul.mubr.f32.vlgmr.msra.gmra.mxu1 %v896_v47  ;;  %v2583_v47 = vld [vmem:[#allocation4 + $0x38] sm:$0xff] }
 0x3e8   :  { %1104 = vmatpush1.msra.mxu0 %v2418_v46  ;;  %1175 = vmatpush1.msra.mxu1 %v2421_v1  ;;  %3008 = vst [vmem:[#allocation25_spill] sm:$0xff] %v2583_v47 }
 0x3e9   :  { %1105 = vmatprep.subr.mxu0 %v2424_v50  ;;  %1176 = vmatprep.subr.mxu1 %v2427_v49 }
 0x3ea   :  { %1106 = vmatpush1.msra.mxu0 %v2430_v4  ;;  %1177 = vmatpush1.msra.mxu1 %v2433_v58 }
 0x3eb   :  { %1107 = vmatprep.subr.mxu0 %v2436_v5  ;;  %1178 = vmatprep.subr.mxu1 %v2439_v6 }
 0x3ec   :  { %1108 = vmatpush1.msra.mxu0 %v2442_v7  ;;  %1179 = vmatpush1.msra.mxu1 %v2445_v8 }
 0x3ed   :  { %1109 = vmatprep.subr.mxu0 %v2448_v9  ;;  %1180 = vmatprep.subr.mxu1 %v2451_v10 }
 0x3ee   :  { %1110 = vmatpush1.msra.mxu0 %v2454_v11  ;;  %1181 = vmatpush1.msra.mxu1 %v2457_v12 }
 0x3ef   :  { %1111 = vmatprep.subr.mxu0 %v2460_v13  ;;  %1182 = vmatprep.subr.mxu1 %v2463_v14 }
 0x3f0   :  { %1112 = vmatpush1.msra.mxu0 %v2466_v15  ;;  %1183 = vmatpush1.msra.mxu1 %v2469_v16 }
 0x3f1   :  { %1113 = vmatprep.subr.mxu0 %v2472_v17  ;;  %1184 = vmatprep.subr.mxu1 %v2475_v18 }
 0x3f2   :  { %1114 = vmatpush1.msra.mxu0 %v2478_v19  ;;  %1185 = vmatpush1.msra.mxu1 %v2481_v20 }
 0x3f3   :  { %1115 = vmatprep.subr.mxu0 %v2484_v21  ;;  %1186 = vmatprep.subr.mxu1 %v2487_v22 }
 0x3f4   :  { %1116 = vmatpush1.msra.mxu0 %v2490_v23  ;;  %1187 = vmatpush1.msra.mxu1 %v2493_v25 }
 0x3f5   :  { %1117 = vmatprep.subr.mxu0 %v2496_v28  ;;  %1188 = vmatprep.subr.mxu1 %v2499_v30 }
 0x3f6   :  { %1118 = vmatpush1.msra.mxu0 %v2502_v31  ;;  %1189 = vmatpush1.msra.mxu1 %v2505_v32 }
 0x3f7   :  { %1119 = vmatprep.subr.mxu0 %v2508_v33  ;;  %1190 = vmatprep.subr.mxu1 %v2511_v35 }
 0x3f8   :  { %1120 = vmatpush1.msra.mxu0 %v2514_v36  ;;  %1191 = vmatpush1.msra.mxu1 %v2517_v37 }
 0x3f9   :  { %1121 = vmatprep.subr.mxu0 %v2520_v38  ;;  %1192 = vmatprep.subr.mxu1 %v2523_v39 }
 0x3fa   :  { %1122 = vmatpush1.msra.mxu0 %v2526_v40  ;;  %1193 = vmatpush1.msra.mxu1 %v2529_v41 }
 0x3fb   :  { %1123 = vmatprep.subr.mxu0 %v2532_v60  ;;  %1194 = vmatprep.subr.mxu1 %v2535_v54 }
 0x3fc   :  { %1124 = vmatpush1.msra.mxu0 %v2538_v53  ;;  %1195 = vmatpush1.msra.mxu1 %v2541_v51 }
 0x3fd   :  { %1125 = vmatprep.subr.mxu0 %v2544_v48  ;;  %1196 = vmatprep.subr.mxu1 %v2547_v43 }
 0x3fe   :  { %1126 = vmatpush1.msra.mxu0 %v2550_v59  ;;  %1197 = vmatpush1.msra.mxu1 %v2553_v62 }
 0x3ff   :  { %1127 = vmatprep.subr.mxu0 %v2556_v61  ;;  %1198 = vmatprep.subr.mxu1 %v2559_v55 }
 0x400   :  { %1128 = vmatpush1.msra.mxu0 %v2562_v52  ;;  %1199 = vmatpush1.msra.mxu1 %v2565_v56 }
 0x401   :  { %1129 = vmatprep.subr.mxu0 %v2568_v57  ;;  %1200 = vmatprep.subr.mxu1 %v2571_v42  ;;  %v2586_v57 = vld [vmem:[#allocation4 + $0x20] sm:$0xff]  ;;  %v2589_v42 = vld [vmem:[#allocation4 + $0x30] sm:$0xff] }
 0x402   :  { %1130 = vmatpush1.msra.mxu0 %v2574_v44  ;;  %1201 = vmatpush1.msra.mxu1 %v2577_v2  ;;  %3009 = vst [vmem:[#allocation26_spill] sm:$0xff] %v2586_v57  ;;  %3010 = vst [vmem:[#allocation27_spill] sm:$0xff] %v2589_v42  ;;  %v2592_v44 = vld [vmem:[#allocation4 + $0x8] sm:$0xff]  ;;  %v2595_v2 = vld [vmem:[#allocation4 + $0x18] sm:$0xff] }
 0x403   :  { %1131 = vmatprep.subr.mxu0 %v2580_v45  ;;  %1202 = vmatprep.subr.mxu1 %v2583_v47  ;;  %3011 = vst [vmem:[#allocation28_spill] sm:$0xff] %v2592_v44  ;;  %3012 = vst [vmem:[#allocation29_spill] sm:$0xff] %v2595_v2  ;;  %v2598_v45 = vld [vmem:[#allocation4] sm:$0xff]  ;;  %v2602_v47 = vld [vmem:[#allocation4 + $0x10] sm:$0xff] }
 0x404   :  { %1132 = vmatpush1.msra.mxu0 %v2586_v57  ;;  %1203 = vmatpush1.msra.mxu1 %v2589_v42  ;;  %3013 = vst [vmem:[#allocation30_spill] sm:$0xff] %v2598_v45  ;;  %3014 = vst [vmem:[#allocation31_spill] sm:$0xff] %v2602_v47 }
 0x405   :  { %1133 = vmatprep.subr.mxu0 %v2592_v44  ;;  %1204 = vmatprep.subr.mxu1 %v2595_v2  ;;  %v898_v44 = vld [vmem:[#allocation2 + $0x4] ss:$8 sm:$0xf] }
 0x406   :  { %1134 = vmatpush1.msra.mxu0 %v2598_v45  ;;  %1167 = vmatprep.mubr.f32.mxu0 %v2989_v24  ;;  %v903_v42 = vrot.slane %v898_v44, %v2993_v29  ;;  %v907_v45 = vrot.slane %v898_v44, %v2994_v34 }
 0x407   :  { %1205 = vmatpush1.msra.mxu1 %v2602_v47  ;;  %1238 = vmatprep.mubr.f32.mxu1 %v2989_v24  ;;  %v915_v24 = vrot.slane %v898_v44, %v2169_v0 }
 0x408   :  { %1286 = vmatprep.subr.mxu0 %v2404_v26  ;;  %1357 = vmatprep.subr.mxu1 %v2407_v27  ;;  %v911_v27 = vrot.slane %v898_v44, %v2167_v63  ;;  %v3021_v44 = vld [vmem:[#allocation18_spill] sm:$0xff] }
 0x4a7   :  { %v986_v2 = vpop.f32.mrf.mxu0  ;;  %v1057_v57 = vpop.f32.mrf.mxu1 }
 0x4a8   :  { %v987_v56 = vadd.f32 %v986_v2, %v903_v42  ;;  %v1058_v59 = vadd.f32 %v1057_v57, %v911_v27  ;;  %v3020_v57 = vld [vmem:[#allocation17_spill] sm:$0xff] }
 0x4a9   :  { %v988_v52 = vpop.f32.mrf.mxu0  ;;  %v1059_v62 = vpop.f32.mrf.mxu1 }
 0x4aa   :  { %v1062_v55 = vmul.f32 0.5, %v987_v56  ;;  %v989_v61 = vadd.f32 %v988_v52, %v907_v45  ;;  %v1060_v26 = vadd.f32 %v1059_v62, %v915_v24  ;;  %v1064_v29 = vmul.f32 0.5, %v1058_v59 }
 0x4ac   :  { %1701 = vtanh.f32 %v1062_v55  ;;  %v1063_v47 = vmul.f32 0.5, %v989_v61 }
 0x4ae   :  { %1703 = vtanh.f32 %v1063_v47  ;;  %v3022_v47 = vld [vmem:[#allocation19_spill] sm:$0xff] }
 0x4af   :  { %1705 = vtanh.f32 %v1060_v26 }
 0x4b0   :  { %1707 = vtanh.f32 %v1064_v29  ;;  %v3015_v29 = vld [vmem:[#allocation14_spill] sm:$0xff] }
 0x4b9   :  { %v1702_v43 = vpop.eup %1701 }
 0x4ba   :  { %v1068_v48 = vadd.f32 1.0, %v1702_v43  ;;  %v3019_v43 = vld [vmem:[#allocation11_spill] sm:$0xff] }
 0x4bb   :  { %v1704_v42 = vpop.eup %1703 }
 0x4bc   :  { %v1071_v2 = vmul.f32 0.5, %v1068_v48  ;;  %v1069_v34 = vadd.f32 1.0, %v1704_v42  ;;  %v1706_v52 = vpop.eup %1705  ;;  %v3018_v48 = vld [vmem:[#allocation10_spill] sm:$0xff]  ;;  %v3023_v42 = vld [vmem:[#allocation20_spill] sm:$0xff] }
 0x4bd   :  { %v1708_v24 = vpop.eup %1707 }
 0x4be   :  { %v1072_v56 = vmul.f32 0.5, %v1069_v34  ;;  %v1076_v61 = vmul.f32 %v1706_v52, %v1071_v2  ;;  %v1070_v62 = vadd.f32 1.0, %v1708_v24  ;;  %v3016_v34 = vld [vmem:[#allocation15_spill] sm:$0xff]  ;;  %v3024_v2 = vld [vmem:[#allocation21_spill] sm:$0xff]  ;;  %v3029_v24 = vld [vmem:[#allocation26_spill] sm:$0xff] }
 0x4bf   :  { %v3026_v52 = vld [vmem:[#allocation23_spill] sm:$0xff] }
 0x4c0   :  { %v1075_v55 = vmul.f32 %v1072_v56, %v2415_v3  ;;  %v1073_v26 = vmul.f32 0.5, %v1070_v62  ;;  %v3017_v3 = vld [vmem:[#allocation16_spill] sm:$0xff]  ;;  %v3025_v56 = vld [vmem:[#allocation22_spill] sm:$0xff]  ;;  %v3030_v62 = vld [vmem:[#allocation27_spill] sm:$0xff] }
 0x4c2   :  { %v2613_v45 = vadd.f32 %v1076_v61, %v1075_v55  ;;  %v3027_v55 = vld [vmem:[#allocation24_spill] sm:$0xff]  ;;  %v3028_v61 = vld [vmem:[#allocation25_spill] sm:$0xff] }
 0x4c4   :  { %1709 = vtanh.f32 %v2613_v45 }
 0x4d1   :  { %v1710_v27 = vpop.eup %1709 }
 0x4d2   :  { %v1079_v59 = vmul.f32 %v1710_v27, %v1073_v26  ;;  %v3031_v26 = vld [vmem:[#allocation28_spill] sm:$0xff]  ;;  %v3032_v27 = vld [vmem:[#allocation29_spill] sm:$0xff] }
 0x4d4   :  { %1168 = vmatmul.mubr.f32.vlgmr.msra.gmra.mxu0 %v1079_v59  ;;  %1239 = vmatmul.mubr.f32.vlgmr.msra.gmra.mxu1 %v1079_v59  ;;  %v3033_v59 = vld [vmem:[#allocation30_spill] sm:$0xff] }
 0x4d5   :  { %1287 = vmatpush1.msra.mxu0 %v2418_v46  ;;  %1358 = vmatpush1.msra.mxu1 %v2421_v1 }
 0x4d6   :  { %1288 = vmatprep.subr.mxu0 %v2424_v50  ;;  %1359 = vmatprep.subr.mxu1 %v2427_v49 }
 0x4d7   :  { %1289 = vmatpush1.msra.mxu0 %v2430_v4  ;;  %1360 = vmatpush1.msra.mxu1 %v2433_v58 }
 0x4d8   :  { %1290 = vmatprep.subr.mxu0 %v2436_v5  ;;  %1361 = vmatprep.subr.mxu1 %v2439_v6 }
 0x4d9   :  { %1291 = vmatpush1.msra.mxu0 %v2442_v7  ;;  %1362 = vmatpush1.msra.mxu1 %v2445_v8 }
 0x4da   :  { %1292 = vmatprep.subr.mxu0 %v2448_v9  ;;  %1363 = vmatprep.subr.mxu1 %v2451_v10 }
 0x4db   :  { %1293 = vmatpush1.msra.mxu0 %v2454_v11  ;;  %1364 = vmatpush1.msra.mxu1 %v2457_v12 }
 0x4dc   :  { %1294 = vmatprep.subr.mxu0 %v2460_v13  ;;  %1365 = vmatprep.subr.mxu1 %v2463_v14 }
 0x4dd   :  { %1295 = vmatpush1.msra.mxu0 %v2466_v15  ;;  %1366 = vmatpush1.msra.mxu1 %v2469_v16 }
 0x4de   :  { %1296 = vmatprep.subr.mxu0 %v2472_v17  ;;  %1367 = vmatprep.subr.mxu1 %v2475_v18 }
 0x4df   :  { %1297 = vmatpush1.msra.mxu0 %v2478_v19  ;;  %1368 = vmatpush1.msra.mxu1 %v2481_v20 }
 0x4e0   :  { %1298 = vmatprep.subr.mxu0 %v2484_v21  ;;  %1369 = vmatprep.subr.mxu1 %v2487_v22 }
 0x4e1   :  { %1299 = vmatpush1.msra.mxu0 %v2490_v23  ;;  %1370 = vmatpush1.msra.mxu1 %v2493_v25 }
 0x4e2   :  { %1300 = vmatprep.subr.mxu0 %v2496_v28  ;;  %1371 = vmatprep.subr.mxu1 %v2499_v30 }
 0x4e3   :  { %1301 = vmatpush1.msra.mxu0 %v2502_v31  ;;  %1372 = vmatpush1.msra.mxu1 %v2505_v32 }
 0x4e4   :  { %1302 = vmatprep.subr.mxu0 %v2508_v33  ;;  %1373 = vmatprep.subr.mxu1 %v2511_v35 }
 0x4e5   :  { %1303 = vmatpush1.msra.mxu0 %v2514_v36  ;;  %1374 = vmatpush1.msra.mxu1 %v2517_v37 }
 0x4e6   :  { %1304 = vmatprep.subr.mxu0 %v2520_v38  ;;  %1375 = vmatprep.subr.mxu1 %v2523_v39 }
 0x4e7   :  { %1305 = vmatpush1.msra.mxu0 %v2526_v40  ;;  %1376 = vmatpush1.msra.mxu1 %v2529_v41 }
 0x4e8   :  { %1306 = vmatprep.subr.mxu0 %v2532_v60  ;;  %1377 = vmatprep.subr.mxu1 %v2535_v54 }
 0x4e9   :  { %1307 = vmatpush1.msra.mxu0 %v2538_v53  ;;  %1378 = vmatpush1.msra.mxu1 %v2541_v51 }
 0x4ea   :  { %1308 = vmatprep.subr.mxu0 %v3015_v29  ;;  %1379 = vmatprep.subr.mxu1 %v3016_v34 }
 0x4eb   :  { %1309 = vmatpush1.msra.mxu0 %v3017_v3  ;;  %1380 = vmatpush1.msra.mxu1 %v3018_v48 }
 0x4ec   :  { %1310 = vmatprep.subr.mxu0 %v3019_v43  ;;  %1381 = vmatprep.subr.mxu1 %v3020_v57 }
 0x4ed   :  { %1311 = vmatpush1.msra.mxu0 %v3021_v44  ;;  %1382 = vmatpush1.msra.mxu1 %v3022_v47  ;;  %v3039_v44 = vld [vmem:[#allocation38_spill] sm:$0xff] }
 0x4ee   :  { %1312 = vmatprep.subr.mxu0 %v3023_v42  ;;  %1383 = vmatprep.subr.mxu1 %v3024_v2  ;;  %v3034_v42 = vmov 0.0   ;;  %v3035_v2 = vld [vmem:[#allocation31_spill] sm:$0xff] }
 0x4ef   :  { %1313 = vmatpush1.msra.mxu0 %v3025_v56  ;;  %1384 = vmatpush1.msra.mxu1 %v3026_v52  ;;  %v3036_v52 = vld [vmem:[#allocation12_spill] sm:$0xff] }
 0x4f0   :  { %1314 = vmatprep.subr.mxu0 %v3027_v55  ;;  %1385 = vmatprep.subr.mxu1 %v3028_v61  ;;  %v3037_v55 = vld [vmem:[#allocation13_spill] sm:$0xff] }
 0x4f1   :  { %1315 = vmatpush1.msra.mxu0 %v3029_v24  ;;  %1386 = vmatpush1.msra.mxu1 %v3030_v62  ;;  %v1081_v61 = vld [vmem:[#allocation2 + $0x5] ss:$8 sm:$0xf] }
 0x4f2   :  { %1316 = vmatprep.subr.mxu0 %v3031_v26  ;;  %1387 = vmatprep.subr.mxu1 %v3032_v27  ;;  %v3038_v24 = vld [vmem:[#allocation37_spill] sm:$0xff]  ;;  %v1090_v27 = vrot.slane %v1081_v61, %v3039_v44 }
 0x4f3   :  { %1317 = vmatpush1.msra.mxu0 %v3033_v59  ;;  %1350 = vmatprep.mubr.f32.mxu0 %v3034_v42  ;;  %v1086_v56 = vrot.slane %v1081_v61, %v3038_v24 }
 0x4f4   :  { %1388 = vmatpush1.msra.mxu1 %v3035_v2  ;;  %1421 = vmatprep.mubr.f32.mxu1 %v3034_v42  ;;  %v1098_v42 = vrot.slane %v1081_v61, %v2169_v0 }
 0x4f5   :  { %1469 = vmatprep.subr.mxu0 %v3036_v52  ;;  %1540 = vmatprep.subr.mxu1 %v3037_v55  ;;  %v1094_v55 = vrot.slane %v1081_v61, %v2167_v63 }
 0x594   :  { %v1169_v62 = vpop.f32.mrf.mxu0  ;;  %v1240_v47 = vpop.f32.mrf.mxu1 }
 0x595   :  { %v1170_v26 = vadd.f32 %v1169_v62, %v1086_v56  ;;  %v1241_v3 = vadd.f32 %v1240_v47, %v1094_v55 }
 0x596   :  { %v1171_v57 = vpop.f32.mrf.mxu0  ;;  %v1242_v48 = vpop.f32.mrf.mxu1 }
 0x597   :  { %v1245_v59 = vmul.f32 0.5, %v1170_v26  ;;  %v1172_v43 = vadd.f32 %v1171_v57, %v1090_v27  ;;  %v1243_v52 = vadd.f32 %v1242_v48, %v1098_v42  ;;  %v1247_v24 = vmul.f32 0.5, %v1241_v3 }
 0x599   :  { %1711 = vtanh.f32 %v1245_v59  ;;  %v1246_v2 = vmul.f32 0.5, %v1172_v43 }
 0x59b   :  { %1713 = vtanh.f32 %v1246_v2 }
 0x59c   :  { %1715 = vtanh.f32 %v1243_v52 }
 0x59d   :  { %1717 = vtanh.f32 %v1247_v24 }
 0x5a6   :  { %v1712_v34 = vpop.eup %1711 }
 0x5a7   :  { %v1251_v29 = vadd.f32 1.0, %v1712_v34 }
 0x5a8   :  { %v1714_v56 = vpop.eup %1713 }
 0x5a9   :  { %v1254_v62 = vmul.f32 0.5, %v1251_v29  ;;  %v1252_v44 = vadd.f32 1.0, %v1714_v56  ;;  %v1716_v57 = vpop.eup %1715 }
 0x5aa   :  { %v1718_v48 = vpop.eup %1717 }
 0x5ab   :  { %v1255_v26 = vmul.f32 0.5, %v1252_v44  ;;  %v1259_v43 = vmul.f32 %v1716_v57, %v1254_v62  ;;  %v1253_v42 = vadd.f32 1.0, %v1718_v48 }
 0x5ad   :  { %v1258_v27 = vmul.f32 %v1255_v26, %v2613_v45  ;;  %v1256_v2 = vmul.f32 0.5, %v1253_v42 }
 0x5af   :  { %v2687_v59 = vadd.f32 %v1259_v43, %v1258_v27  ;;  %v1447_v27 = vld [vmem:[#allocation2 + $0x7] ss:$8 sm:$0xf] }
 0x5b1   :  { %1719 = vtanh.f32 %v2687_v59 }
 0x5be   :  { %v1720_v47 = vpop.eup %1719 }
 0x5bf   :  { %v1262_v3 = vmul.f32 %v1720_v47, %v1256_v2 }
 0x5c1   :  { %1351 = vmatmul.mubr.f32.vlgmr.msra.gmra.mxu0 %v1262_v3  ;;  %1422 = vmatmul.mubr.f32.vlgmr.msra.gmra.mxu1 %v1262_v3 }
 0x5c2   :  { %1470 = vmatpush1.msra.mxu0 %v2418_v46  ;;  %1541 = vmatpush1.msra.mxu1 %v2421_v1  ;;  %v3040_v46 = vld [vmem:[#allocation14_spill] sm:$0xff]  ;;  %v3041_v1 = vld [vmem:[#allocation15_spill] sm:$0xff] }
 0x5c3   :  { %1471 = vmatprep.subr.mxu0 %v2424_v50  ;;  %1542 = vmatprep.subr.mxu1 %v2427_v49  ;;  %v3042_v50 = vld [vmem:[#allocation16_spill] sm:$0xff]  ;;  %v3043_v49 = vld [vmem:[#allocation10_spill] sm:$0xff] }
 0x5c4   :  { %1472 = vmatpush1.msra.mxu0 %v2430_v4  ;;  %1543 = vmatpush1.msra.mxu1 %v2433_v58  ;;  %v3044_v4 = vld [vmem:[#allocation11_spill] sm:$0xff]  ;;  %v3045_v58 = vld [vmem:[#allocation17_spill] sm:$0xff] }
 0x5c5   :  { %1473 = vmatprep.subr.mxu0 %v2436_v5  ;;  %1544 = vmatprep.subr.mxu1 %v2439_v6  ;;  %v3046_v5 = vld [vmem:[#allocation18_spill] sm:$0xff]  ;;  %v3047_v6 = vld [vmem:[#allocation19_spill] sm:$0xff] }
 0x5c6   :  { %1474 = vmatpush1.msra.mxu0 %v2442_v7  ;;  %1545 = vmatpush1.msra.mxu1 %v2445_v8  ;;  %v3048_v7 = vld [vmem:[#allocation20_spill] sm:$0xff]  ;;  %v3049_v8 = vld [vmem:[#allocation21_spill] sm:$0xff] }
 0x5c7   :  { %1475 = vmatprep.subr.mxu0 %v2448_v9  ;;  %1546 = vmatprep.subr.mxu1 %v2451_v10  ;;  %v3050_v9 = vld [vmem:[#allocation22_spill] sm:$0xff]  ;;  %v3051_v10 = vld [vmem:[#allocation23_spill] sm:$0xff] }
 0x5c8   :  { %1476 = vmatpush1.msra.mxu0 %v2454_v11  ;;  %1547 = vmatpush1.msra.mxu1 %v2457_v12  ;;  %v3052_v11 = vld [vmem:[#allocation24_spill] sm:$0xff]  ;;  %v3053_v12 = vld [vmem:[#allocation25_spill] sm:$0xff] }
 0x5c9   :  { %1477 = vmatprep.subr.mxu0 %v2460_v13  ;;  %1548 = vmatprep.subr.mxu1 %v2463_v14  ;;  %v3054_v13 = vld [vmem:[#allocation26_spill] sm:$0xff]  ;;  %v3055_v14 = vld [vmem:[#allocation27_spill] sm:$0xff] }
 0x5ca   :  { %1478 = vmatpush1.msra.mxu0 %v2466_v15  ;;  %1549 = vmatpush1.msra.mxu1 %v2469_v16  ;;  %v3056_v15 = vld [vmem:[#allocation28_spill] sm:$0xff]  ;;  %v3057_v16 = vld [vmem:[#allocation29_spill] sm:$0xff] }
 0x5cb   :  { %1479 = vmatprep.subr.mxu0 %v2472_v17  ;;  %1550 = vmatprep.subr.mxu1 %v2475_v18  ;;  %v3058_v17 = vld [vmem:[#allocation30_spill] sm:$0xff]  ;;  %v3059_v18 = vmov 0.0  }
 0x5cc   :  { %1480 = vmatpush1.msra.mxu0 %v2478_v19  ;;  %1551 = vmatpush1.msra.mxu1 %v2481_v20  ;;  %v3060_v19 = vld [vmem:[#allocation31_spill] sm:$0xff] }
 0x5cd   :  { %1481 = vmatprep.subr.mxu0 %v2484_v21  ;;  %1552 = vmatprep.subr.mxu1 %v2487_v22  ;;  %v1264_v20 = vld [vmem:[#allocation2 + $0x6] ss:$8 sm:$0xf] }
 0x5ce   :  { %1482 = vmatpush1.msra.mxu0 %v2490_v23  ;;  %1553 = vmatpush1.msra.mxu1 %v2493_v25  ;;  %v3061_v21 = vld [vmem:[#allocation37_spill] sm:$0xff] }
 0x5cf   :  { %1483 = vmatprep.subr.mxu0 %v2496_v28  ;;  %1554 = vmatprep.subr.mxu1 %v2499_v30  ;;  %v1269_v22 = vrot.slane %v1264_v20, %v3061_v21  ;;  %v3062_v30 = vld [vmem:[#allocation38_spill] sm:$0xff]  ;;  %v1452_v43 = vrot.slane %v1447_v27, %v3061_v21 }
 0x5d0   :  { %1484 = vmatpush1.msra.mxu0 %v2502_v31  ;;  %1555 = vmatpush1.msra.mxu1 %v2505_v32  ;;  %v1273_v31 = vrot.slane %v1264_v20, %v3062_v30  ;;  %v1456_v47 = vrot.slane %v1447_v27, %v3062_v30 }
 0x5d1   :  { %1485 = vmatprep.subr.mxu0 %v2508_v33  ;;  %1556 = vmatprep.subr.mxu1 %v2511_v35 }
 0x5d2   :  { %1486 = vmatpush1.msra.mxu0 %v2514_v36  ;;  %1557 = vmatpush1.msra.mxu1 %v2517_v37 }
 0x5d3   :  { %1487 = vmatprep.subr.mxu0 %v2520_v38  ;;  %1558 = vmatprep.subr.mxu1 %v2523_v39  ;;  %v1281_v38 = vrot.slane %v1264_v20, %v2169_v0 }
 0x5d4   :  { %1488 = vmatpush1.msra.mxu0 %v2526_v40  ;;  %1559 = vmatpush1.msra.mxu1 %v2529_v41  ;;  %v1277_v40 = vrot.slane %v1264_v20, %v2167_v63 }
 0x5d5   :  { %1489 = vmatprep.subr.mxu0 %v2532_v60  ;;  %1560 = vmatprep.subr.mxu1 %v2535_v54 }
 0x5d6   :  { %1490 = vmatpush1.msra.mxu0 %v2538_v53  ;;  %1561 = vmatpush1.msra.mxu1 %v2541_v51 }
 0x5d7   :  { %1491 = vmatprep.subr.mxu0 %v3040_v46  ;;  %1562 = vmatprep.subr.mxu1 %v3041_v1 }
 0x5d8   :  { %1492 = vmatpush1.msra.mxu0 %v3042_v50  ;;  %1563 = vmatpush1.msra.mxu1 %v3043_v49  ;;  %v1464_v49 = vrot.slane %v1447_v27, %v2169_v0 }
 0x5d9   :  { %1493 = vmatprep.subr.mxu0 %v3044_v4  ;;  %1564 = vmatprep.subr.mxu1 %v3045_v58  ;;  %v1460_v58 = vrot.slane %v1447_v27, %v2167_v63  ;;  %v1629_v63 = vld [vmem:[%s2773_s4] sm:$0x1] }
 0x5da   :  { %1494 = vmatpush1.msra.mxu0 %v3046_v5  ;;  %1565 = vmatpush1.msra.mxu1 %v3047_v6 }
 0x5db   :  { %1495 = vmatprep.subr.mxu0 %v3048_v7  ;;  %1566 = vmatprep.subr.mxu1 %v3049_v8 }
 0x5dc   :  { %1496 = vmatpush1.msra.mxu0 %v3050_v9  ;;  %1567 = vmatpush1.msra.mxu1 %v3051_v10 }
 0x5dd   :  { %1497 = vmatprep.subr.mxu0 %v3052_v11  ;;  %1568 = vmatprep.subr.mxu1 %v3053_v12 }
 0x5de   :  { %1498 = vmatpush1.msra.mxu0 %v3054_v13  ;;  %1569 = vmatpush1.msra.mxu1 %v3055_v14 }
 0x5df   :  { %1499 = vmatprep.subr.mxu0 %v3056_v15  ;;  %1570 = vmatprep.subr.mxu1 %v3057_v16 }
 0x5e0   :  { %1500 = vmatpush1.msra.mxu0 %v3058_v17  ;;  %1533 = vmatprep.mubr.f32.mxu0 %v3059_v18 }
 0x5e1   :  { %1571 = vmatpush1.msra.mxu1 %v3060_v19  ;;  %1604 = vmatprep.mubr.f32.mxu1 %v3059_v18 }
 0x681   :  { %v1352_v23 = vpop.f32.mrf.mxu0  ;;  %v1423_v25 = vpop.f32.mrf.mxu1 }
 0x682   :  { %v1353_v28 = vadd.f32 %v1352_v23, %v1269_v22  ;;  %v1424_v41 = vadd.f32 %v1423_v25, %v1277_v40  ;;  %v1635_v23 = vld [vmem:[#allocation3] sm:$0x1] }
 0x683   :  { %v1354_v32 = vpop.f32.mrf.mxu0  ;;  %v1425_v36 = vpop.f32.mrf.mxu1 }
 0x684   :  { %v1428_v33 = vmul.f32 0.5, %v1353_v28  ;;  %v1355_v35 = vadd.f32 %v1354_v32, %v1273_v31  ;;  %v1426_v39 = vadd.f32 %v1425_v36, %v1281_v38  ;;  %v1430_v60 = vmul.f32 0.5, %v1424_v41 }
 0x686   :  { %1721 = vtanh.f32 %v1428_v33  ;;  %v1429_v37 = vmul.f32 0.5, %v1355_v35 }
 0x688   :  { %1723 = vtanh.f32 %v1429_v37 }
 0x689   :  { %1725 = vtanh.f32 %v1426_v39 }
 0x68a   :  { %1727 = vtanh.f32 %v1430_v60 }
 0x693   :  { %v1722_v54 = vpop.eup %1721 }
 0x694   :  { %v1434_v53 = vadd.f32 1.0, %v1722_v54 }
 0x695   :  { %v1724_v51 = vpop.eup %1723 }
 0x696   :  { %v1437_v45 = vmul.f32 0.5, %v1434_v53  ;;  %v1435_v29 = vadd.f32 1.0, %v1724_v51  ;;  %v1726_v44 = vpop.eup %1725 }
 0x697   :  { %v1728_v55 = vpop.eup %1727 }
 0x698   :  { %v1438_v34 = vmul.f32 0.5, %v1435_v29  ;;  %v1442_v24 = vmul.f32 %v1726_v44, %v1437_v45  ;;  %v1436_v56 = vadd.f32 1.0, %v1728_v55 }
 0x69a   :  { %v1441_v61 = vmul.f32 %v1438_v34, %v2687_v59  ;;  %v1439_v62 = vmul.f32 0.5, %v1436_v56 }
 0x69c   :  { %v1443_v52 = vadd.f32 %v1442_v24, %v1441_v61 }
 0x69e   :  { %1729 = vtanh.f32 %v1443_v52 }
 0x6ab   :  { %v1730_v26 = vpop.eup %1729 }
 0x6ac   :  { %v1445_v57 = vmul.f32 %v1730_v26, %v1439_v62 }
 0x6ae   :  { %1534 = vmatmul.mubr.f32.vlgmr.msra.gmra.mxu0 %v1445_v57  ;;  %1605 = vmatmul.mubr.f32.vlgmr.msra.gmra.mxu1 %v1445_v57 }
 0x76e   :  { %v1535_v48 = vpop.f32.mrf.mxu0  ;;  %v1606_v42 = vpop.f32.mrf.mxu1 }
 0x76f   :  { %v1536_v2 = vadd.f32 %v1535_v48, %v1452_v43  ;;  %v1607_v5 = vadd.f32 %v1606_v42, %v1460_v58 }
 0x770   :  { %v1537_v3 = vpop.f32.mrf.mxu0  ;;  %v1608_v1 = vpop.f32.mrf.mxu1 }
 0x771   :  { %v1611_v59 = vmul.f32 0.5, %v1536_v2  ;;  %v1538_v46 = vadd.f32 %v1537_v3, %v1456_v47  ;;  %v1609_v4 = vadd.f32 %v1608_v1, %v1464_v49  ;;  %v1613_v6 = vmul.f32 0.5, %v1607_v5 }
 0x773   :  { %1731 = vtanh.f32 %v1611_v59  ;;  %v1612_v50 = vmul.f32 0.5, %v1538_v46 }
 0x775   :  { %1733 = vtanh.f32 %v1612_v50 }
 0x776   :  { %1735 = vtanh.f32 %v1609_v4 }
 0x777   :  { %1737 = vtanh.f32 %v1613_v6 }
 0x780   :  { %v1732_v7 = vpop.eup %1731 }
 0x781   :  { %v1617_v8 = vadd.f32 1.0, %v1732_v7 }
 0x782   :  { %v1734_v9 = vpop.eup %1733 }
 0x783   :  { %v1620_v10 = vmul.f32 0.5, %v1617_v8  ;;  %v1618_v11 = vadd.f32 1.0, %v1734_v9  ;;  %v1736_v13 = vpop.eup %1735 }
 0x784   :  { %v1738_v0 = vpop.eup %1737 }
 0x785   :  { %v1621_v12 = vmul.f32 0.5, %v1618_v11  ;;  %v1625_v15 = vmul.f32 %v1736_v13, %v1620_v10  ;;  %v1619_v17 = vadd.f32 1.0, %v1738_v0 }
 0x787   :  { %v1624_v14 = vmul.f32 %v1621_v12, %v1443_v52  ;;  %v1622_v18 = vmul.f32 0.5, %v1619_v17 }
 0x789   :  { %v1626_v16 = vadd.f32 %v1625_v15, %v1624_v14 }
 0x78b   :  { %1739 = vtanh.f32 %v1626_v16 }
 0x798   :  { %v1740_v19 = vpop.eup %1739 }
 0x799   :  { %v1628_v20 = vmul.f32 %v1740_v19, %v1622_v18 }
 0x79b   :  { %v1630_v21 = vmul.f32 %v1629_v63, %v1628_v20 }
 0x79d   :  { %v1632_v22 = vsel %vm1631_vm0, %v1630_v21, 0.0 }
 0x79e   :  { %1633 = vadd.xlane.f32.xlu0 %v1632_v22 }
 0x827   :  { %v1634_v25 = vpop.xlane.xlu0 %1633 }
 0x828   :  { %v1636_v28 = vadd.f32 %v1635_v23, %v1634_v25 }
 0x82a   :  { %1638 = vst.msk [vmem:[#allocation7] sm:$0x1] %vm1637_vm1, %v1636_v28 }
 0x82b   :  { %1836 = shalt.err (!%p1833_p9)
}
 0x82c   :  { %1648 = dma.vmem_to_hbm [thread:$0]  %s1646_s10, 16, %s2775_s6, [#allocation6]  }
 0x82d   :  { %1847 = dma.done.wait [#allocation6], 16  }
 0x82e   :  { %1848 = vsyncadd [#allocation6], 4294967280 }
 0x82f   :  { %1652 = vsyncpa [#allocation5], 1 }
 0x830   :  { %1653 = vsyncpa [#allocation6], 1 }

</bundles_post_ra>
